<compile_context>
chip_gen: v6e
topology: v6e:2x2x1
jax: 0.10.0
libtpu: 0.0.40
codegen_flags: <defaults>
</compile_context>

<pallas_src>
import math
import functools

import jax
import jax.numpy as jnp
from jax.experimental import pallas as pl
from jax.experimental.pallas import tpu as pltpu

EPS = 1e-6


def _layernorm(y, eps=EPS):
    # Matches the reference LayerNorm exactly: unbiased std (N-1 divisor) and
    # normalization by sqrt(std + eps); alpha=1, beta=0 (their init values).
    mean = jnp.mean(y, axis=-1, keepdims=True)
    var = jnp.sum((y - mean) ** 2, axis=-1, keepdims=True) / (y.shape[-1] - 1)
    std = jnp.sqrt(var)
    return (y - mean) * jax.lax.rsqrt(std + eps)  # * alpha(=1) + beta(=0)


def encoder_layer_kernel(xq_ref, xkv_ref, mask_ref,
                         wq_ref, bq_ref, wk_ref, bk_ref, wv_ref, bv_ref,
                         wo_ref, bo_ref, w1_ref, b1_ref, w2_ref, b2_ref,
                         o_ref, *, n_heads):
    f32 = jnp.float32
    bf16 = jnp.bfloat16

    xq = xq_ref[0]            # (TS, D)   bf16  query-side sequence tile
    xkv = xkv_ref[0]          # (S,  D)   bf16  full sequence for K / V
    key_mask = mask_ref[...]  # (1, 1, S) int32 (1 = attend, 0 = masked)

    TS, D = xq.shape
    S = xkv.shape[0]
    H = n_heads
    dk = D // H
    scale = 1.0 / math.sqrt(dk)

    # ---- Multi-head self-attention (heads batched, bf16 MXU, f32 accum) ----
    q = jnp.dot(xq, wq_ref[...], preferred_element_type=f32) + bq_ref[...]
    k = jnp.dot(xkv, wk_ref[...], preferred_element_type=f32) + bk_ref[...]
    v = jnp.dot(xkv, wv_ref[...], preferred_element_type=f32) + bv_ref[...]

    qh = jnp.swapaxes(q.reshape(TS, H, dk), 0, 1).astype(bf16)   # (H, TS, dk)
    kh = jnp.swapaxes(k.reshape(S, H, dk), 0, 1).astype(bf16)    # (H, S,  dk)
    vh = jnp.swapaxes(v.reshape(S, H, dk), 0, 1).astype(bf16)    # (H, S,  dk)

    scores = jnp.einsum('hqd,hkd->hqk', qh, kh,
                        preferred_element_type=f32) * scale      # (H, TS, S)
    # Large finite negative instead of -inf: avoids NaN if every key of a
    # query row is masked; otherwise bit-identical after softmax.
    scores = jnp.where(key_mask == 0, f32(-1e30), scores)
    scores = scores - jnp.max(scores, axis=-1, keepdims=True)
    p = jnp.exp(scores)
    p = p * pl.reciprocal(jnp.sum(p, axis=-1, keepdims=True), approx=True)

    ctx = jnp.einsum('hqk,hkd->hqd', p.astype(bf16), vh,
                     preferred_element_type=f32)                 # (H, TS, dk)
    ctx = jnp.swapaxes(ctx, 0, 1).reshape(TS, D)
    attn = jnp.dot(ctx.astype(bf16), wo_ref[...],
                   preferred_element_type=f32) + bo_ref[...]

    # Skip connection 1 + LayerNorm (dropout is identity in eval mode)
    x1 = _layernorm(xq.astype(f32) + attn)

    # ---- Feed-forward ----
    hdn = jnp.dot(x1.astype(bf16), w1_ref[...],
                  preferred_element_type=f32) + b1_ref[...]
    hdn = jnp.maximum(hdn, 0.0)                                  # ReLU
    ff = jnp.dot(hdn.astype(bf16), w2_ref[...],
                 preferred_element_type=f32) + b2_ref[...]

    # Skip connection 2 + LayerNorm
    o_ref[0] = _layernorm(x1 + ff).astype(o_ref.dtype)


def layernorm_kernel(x_ref, o_ref):
    o_ref[0] = _layernorm(x_ref[0].astype(jnp.float32)).astype(o_ref.dtype)


def _resident_spec(shape):
    # Full array, constant block index -> fetched once, stays in VMEM.
    nd = len(shape)
    return pl.BlockSpec(shape, lambda *_: (0,) * nd)


def encoder_layer(x, mask3, layer_params, *, n_heads, tile_s, vmem_limit_bytes):
    B, S, D = x.shape
    grid = (B, S // tile_s)

    in_specs = [
        pl.BlockSpec((1, tile_s, D), lambda b, s: (b, s, 0)),  # x (queries, tiled)
        pl.BlockSpec((1, S, D), lambda b, s: (b, 0, 0)),       # x (keys/values, full S)
        pl.BlockSpec((1, 1, S), lambda b, s: (b, 0, 0)),       # key mask
    ] + [_resident_spec(p.shape) for p in layer_params]

    kern = functools.partial(encoder_layer_kernel, n_heads=n_heads)
    return pl.pallas_call(
        kern,
        grid=grid,
        out_shape=jax.ShapeDtypeStruct(x.shape, x.dtype),
        in_specs=in_specs,
        out_specs=pl.BlockSpec((1, tile_s, D), lambda b, s: (b, s, 0)),
        compiler_params=pltpu.CompilerParams(
            dimension_semantics=("parallel", "parallel"),
            vmem_limit_bytes=vmem_limit_bytes),
    )(x, x, mask3, *layer_params)


def final_layernorm(x, *, tile_s):
    B, S, D = x.shape
    return pl.pallas_call(
        layernorm_kernel,
        grid=(B, S // tile_s),
        out_shape=jax.ShapeDtypeStruct((B, S, D), jnp.float32),
        in_specs=[pl.BlockSpec((1, tile_s, D), lambda b, s: (b, s, 0))],
        out_specs=pl.BlockSpec((1, tile_s, D), lambda b, s: (b, s, 0)),
        compiler_params=pltpu.CompilerParams(
            dimension_semantics=("parallel", "parallel")),
    )(x)


def make_positional_encoding(seq_len, d_model):
    pos = jnp.arange(seq_len, dtype=jnp.float32)[:, None]
    div = 10000.0 ** (jnp.arange(0, d_model, 2, dtype=jnp.float32) / d_model)
    pe = jnp.zeros((seq_len, d_model), dtype=jnp.float32)
    pe = pe.at[:, 0::2].set(jnp.sin(pos / div))
    pe = pe.at[:, 1::2].set(jnp.cos(pos / div))
    return pe


def init_params(key, vocab_size, d_model, n_layers, d_ff):
    keys = jax.random.split(key, 1 + n_layers)
    emb = jax.random.normal(keys[0], (vocab_size, d_model), jnp.float32) * 0.02

    def init_layer(k):
        ks = jax.random.split(k, 6)
        s = 0.02
        wq = jax.random.normal(ks[0], (d_model, d_model), jnp.float32) * s
        wk = jax.random.normal(ks[1], (d_model, d_model), jnp.float32) * s
        wv = jax.random.normal(ks[2], (d_model, d_model), jnp.float32) * s
        wo = jax.random.normal(ks[3], (d_model, d_model), jnp.float32) * s
        w1 = jax.random.normal(ks[4], (d_model, d_ff), jnp.float32) * s
        w2 = jax.random.normal(ks[5], (d_ff, d_model), jnp.float32) * s
        bq = jnp.zeros((1, d_model), jnp.float32)
        bk = jnp.zeros((1, d_model), jnp.float32)
        bv = jnp.zeros((1, d_model), jnp.float32)
        bo = jnp.zeros((1, d_model), jnp.float32)
        b1 = jnp.zeros((1, d_ff), jnp.float32)
        b2 = jnp.zeros((1, d_model), jnp.float32)
        return (wq, bq, wk, bk, wv, bv, wo, bo, w1, b1, w2, b2)

    layers = [init_layer(keys[1 + i]) for i in range(n_layers)]
    return {'embeddings': emb, 'layers': layers}


def _cast_layer_params(lp):
    # Weights (even positions) -> bf16 for the MXU; biases (odd) stay f32.
    return tuple(p.astype(jnp.bfloat16) if i % 2 == 0 else p.astype(jnp.float32)
                 for i, p in enumerate(lp))


def bert_forward(tokens, mask, params, *, d_model, n_heads, seq_len):
    B, S = tokens.shape
    # Glue: embedding gather + scale + positional encoding (plain JAX).
    x = params['embeddings'][tokens] * math.sqrt(d_model)        # (B, S, D) f32
    pe = make_positional_encoding(seq_len, d_model)
    x = (x + pe[None, :S]).astype(jnp.bfloat16)                  # bf16 between layers
    mask3 = mask.reshape(B, 1, S).astype(jnp.int32)              # (B, 1, S)

    # Sequence tile: multiple of 8 (sublane) dividing S. For real BERT sizes
    # halve this on v7x-class (64 MiB VMEM) parts.
    tile_s = S if S <= 128 else 128
    assert S % tile_s == 0
    vmem_limit_bytes = 48 * 1024 * 1024   # above scoped defaults, < v7x physical

    # Hot path: one Pallas kernel per encoder layer.
    # TODO(synk): cross-pallas_call prefetch of the next layer's weights (P10).
    for layer_params in params['layers']:
        lp = _cast_layer_params(layer_params)
        x = encoder_layer(x, mask3, lp, n_heads=n_heads, tile_s=tile_s,
                          vmem_limit_bytes=vmem_limit_bytes)
    return final_layernorm(x, tile_s=tile_s)


if __name__ == "__main__":
    vocab_size, d_model, n_layers, n_heads, d_ff, seq_len = 100, 32, 2, 4, 64, 8
    batch = 2

    key = jax.random.PRNGKey(0)
    k_tok, k_params = jax.random.split(key)
    tokens = jax.random.randint(k_tok, (batch, seq_len), 0, vocab_size, jnp.int32)
    # Attention mask (B, S): 1 = attend, 0 = masked (last 2 positions of batch 1).
    mask = jnp.ones((batch, seq_len), jnp.int32)
    mask = mask.at[1, -2:].set(0)

    params = init_params(k_params, vocab_size, d_model, n_layers, d_ff)

    out = bert_forward(tokens, mask, params,
                       d_model=d_model, n_heads=n_heads, seq_len=seq_len)
    out = jax.block_until_ready(out)
    assert out.shape == (batch, seq_len, d_model)
    assert out.dtype == jnp.float32
    assert bool(jnp.all(jnp.isfinite(out)))
    print("KERNEL_OK")
</pallas_src>

<mosaic_0001>
module attributes {stable_mosaic.version = 11 : i64} {
  func.func @encoder_layer_kernel(%arg0: i32, %arg1: i32, %arg2: memref<1x8x32xbf16, #tpu.memory_space<vmem>>, %arg3: memref<1x8x32xbf16, #tpu.memory_space<vmem>>, %arg4: memref<1x1x8xi32, #tpu.memory_space<vmem>>, %arg5: memref<32x32xbf16, #tpu.memory_space<vmem>>, %arg6: memref<1x32xf32, #tpu.memory_space<vmem>>, %arg7: memref<32x32xbf16, #tpu.memory_space<vmem>>, %arg8: memref<1x32xf32, #tpu.memory_space<vmem>>, %arg9: memref<32x32xbf16, #tpu.memory_space<vmem>>, %arg10: memref<1x32xf32, #tpu.memory_space<vmem>>, %arg11: memref<32x32xbf16, #tpu.memory_space<vmem>>, %arg12: memref<1x32xf32, #tpu.memory_space<vmem>>, %arg13: memref<32x64xbf16, #tpu.memory_space<vmem>>, %arg14: memref<1x64xf32, #tpu.memory_space<vmem>>, %arg15: memref<64x32xbf16, #tpu.memory_space<vmem>>, %arg16: memref<1x32xf32, #tpu.memory_space<vmem>>, %arg17: memref<1x8x32xbf16, #tpu.memory_space<vmem>>) attributes {dimension_semantics = [#tpu.dimension_semantics<parallel>, #tpu.dimension_semantics<parallel>], iteration_bounds = array<i64: 2, 1>, scalar_prefetch = 0 : i64, scratch_operands = 0 : i64, tpu.core_type = #tpu.core_type<tc>, window_params = [{transform_indices = @transform_0, window_bounds = array<i64: 1, 8, 32>}, {transform_indices = @transform_1, window_bounds = array<i64: 1, 8, 32>}, {transform_indices = @transform_2, window_bounds = array<i64: 1, 1, 8>}, {pipeline_mode = #tpu.pipeline_mode<synchronous>, transform_indices = @transform_3, window_bounds = array<i64: 32, 32>}, {pipeline_mode = #tpu.pipeline_mode<synchronous>, transform_indices = @transform_4, window_bounds = array<i64: 1, 32>}, {pipeline_mode = #tpu.pipeline_mode<synchronous>, transform_indices = @transform_5, window_bounds = array<i64: 32, 32>}, {pipeline_mode = #tpu.pipeline_mode<synchronous>, transform_indices = @transform_6, window_bounds = array<i64: 1, 32>}, {pipeline_mode = #tpu.pipeline_mode<synchronous>, transform_indices = @transform_7, window_bounds = array<i64: 32, 32>}, {pipeline_mode = #tpu.pipeline_mode<synchronous>, transform_indices = @transform_8, window_bounds = array<i64: 1, 32>}, {pipeline_mode = #tpu.pipeline_mode<synchronous>, transform_indices = @transform_9, window_bounds = array<i64: 32, 32>}, {pipeline_mode = #tpu.pipeline_mode<synchronous>, transform_indices = @transform_10, window_bounds = array<i64: 1, 32>}, {pipeline_mode = #tpu.pipeline_mode<synchronous>, transform_indices = @transform_11, window_bounds = array<i64: 32, 64>}, {pipeline_mode = #tpu.pipeline_mode<synchronous>, transform_indices = @transform_12, window_bounds = array<i64: 1, 64>}, {pipeline_mode = #tpu.pipeline_mode<synchronous>, transform_indices = @transform_13, window_bounds = array<i64: 64, 32>}, {pipeline_mode = #tpu.pipeline_mode<synchronous>, transform_indices = @transform_14, window_bounds = array<i64: 1, 32>}, {transform_indices = @transform_15, window_bounds = array<i64: 1, 8, 32>}]} {
    %c0 = arith.constant 0 : index
    %c0_0 = arith.constant 0 : index
    %c0_1 = arith.constant 0 : index
    %0 = vector.load %arg2[%c0, %c0_0, %c0_1] : memref<1x8x32xbf16, #tpu.memory_space<vmem>>, vector<1x8x32xbf16>
    %1 = vector.shape_cast %0 : vector<1x8x32xbf16> to vector<8x32xbf16>
    %c0_2 = arith.constant 0 : index
    %c0_3 = arith.constant 0 : index
    %c0_4 = arith.constant 0 : index
    %2 = vector.load %arg3[%c0_2, %c0_3, %c0_4] : memref<1x8x32xbf16, #tpu.memory_space<vmem>>, vector<1x8x32xbf16>
    %3 = vector.shape_cast %2 : vector<1x8x32xbf16> to vector<8x32xbf16>
    %c0_5 = arith.constant 0 : index
    %c0_6 = arith.constant 0 : index
    %c0_7 = arith.constant 0 : index
    %4 = vector.load %arg4[%c0_5, %c0_6, %c0_7] : memref<1x1x8xi32, #tpu.memory_space<vmem>>, vector<1x1x8xi32>
    %c0_8 = arith.constant 0 : index
    %c0_9 = arith.constant 0 : index
    %5 = vector.load %arg5[%c0_8, %c0_9] : memref<32x32xbf16, #tpu.memory_space<vmem>>, vector<32x32xbf16>
    %cst = arith.constant dense<0.000000e+00> : vector<8x32xf32>
    %6 = tpu.matmul %1, %5, %cst {dimension_numbers = #tpu.dot_dimension_numbers<[1], [0], [0], [1], [0, 0, 1, 1], [], []>} : vector<8x32xbf16>, vector<32x32xbf16>, vector<8x32xf32> -> vector<8x32xf32>
    %c0_10 = arith.constant 0 : index
    %c0_11 = arith.constant 0 : index
    %7 = vector.load %arg6[%c0_10, %c0_11] : memref<1x32xf32, #tpu.memory_space<vmem>>, vector<1x32xf32>
    %8 = vector.broadcast %7 : vector<1x32xf32> to vector<8x32xf32>
    %9 = arith.addf %6, %8 : vector<8x32xf32>
    %c0_12 = arith.constant 0 : index
    %c0_13 = arith.constant 0 : index
    %10 = vector.load %arg7[%c0_12, %c0_13] : memref<32x32xbf16, #tpu.memory_space<vmem>>, vector<32x32xbf16>
    %cst_14 = arith.constant dense<0.000000e+00> : vector<8x32xf32>
    %11 = tpu.matmul %3, %10, %cst_14 {dimension_numbers = #tpu.dot_dimension_numbers<[1], [0], [0], [1], [0, 0, 1, 1], [], []>} : vector<8x32xbf16>, vector<32x32xbf16>, vector<8x32xf32> -> vector<8x32xf32>
    %c0_15 = arith.constant 0 : index
    %c0_16 = arith.constant 0 : index
    %12 = vector.load %arg8[%c0_15, %c0_16] : memref<1x32xf32, #tpu.memory_space<vmem>>, vector<1x32xf32>
    %13 = vector.broadcast %12 : vector<1x32xf32> to vector<8x32xf32>
    %14 = arith.addf %11, %13 : vector<8x32xf32>
    %c0_17 = arith.constant 0 : index
    %c0_18 = arith.constant 0 : index
    %15 = vector.load %arg9[%c0_17, %c0_18] : memref<32x32xbf16, #tpu.memory_space<vmem>>, vector<32x32xbf16>
    %cst_19 = arith.constant dense<0.000000e+00> : vector<8x32xf32>
    %16 = tpu.matmul %3, %15, %cst_19 {dimension_numbers = #tpu.dot_dimension_numbers<[1], [0], [0], [1], [0, 0, 1, 1], [], []>} : vector<8x32xbf16>, vector<32x32xbf16>, vector<8x32xf32> -> vector<8x32xf32>
    %c0_20 = arith.constant 0 : index
    %c0_21 = arith.constant 0 : index
    %17 = vector.load %arg10[%c0_20, %c0_21] : memref<1x32xf32, #tpu.memory_space<vmem>>, vector<1x32xf32>
    %18 = vector.broadcast %17 : vector<1x32xf32> to vector<8x32xf32>
    %19 = arith.addf %16, %18 : vector<8x32xf32>
    %20 = vector.shape_cast %9 : vector<8x32xf32> to vector<8x4x8xf32>
    %21 = tpu.transpose %20, [1, 0, 2] : vector<8x4x8xf32> -> vector<4x8x8xf32>
    %22 = arith.truncf %21 : vector<4x8x8xf32> to vector<4x8x8xbf16>
    %23 = vector.shape_cast %14 : vector<8x32xf32> to vector<8x4x8xf32>
    %24 = tpu.transpose %23, [1, 0, 2] : vector<8x4x8xf32> -> vector<4x8x8xf32>
    %25 = arith.truncf %24 : vector<4x8x8xf32> to vector<4x8x8xbf16>
    %26 = vector.shape_cast %19 : vector<8x32xf32> to vector<8x4x8xf32>
    %27 = tpu.transpose %26, [1, 0, 2] : vector<8x4x8xf32> -> vector<4x8x8xf32>
    %28 = arith.truncf %27 : vector<4x8x8xf32> to vector<4x8x8xbf16>
    "tpu.trace_start"() <{level = 10 : i32, message = "hqd,hkd->hqk"}> : () -> ()
    %cst_22 = arith.constant dense<0.000000e+00> : vector<4x8x8xf32>
    %29 = tpu.matmul %22, %25, %cst_22 {dimension_numbers = #tpu.dot_dimension_numbers<[2], [2], [1], [1], [0, 0, 0, 1, 1, 1], [0], [0]>} : vector<4x8x8xbf16>, vector<4x8x8xbf16>, vector<4x8x8xf32> -> vector<4x8x8xf32>
    "tpu.trace_stop"() : () -> ()
    %cst_23 = arith.constant 0.353553385 : f32
    %30 = vector.broadcast %cst_23 : f32 to vector<4x8x8xf32>
    %31 = arith.mulf %29, %30 : vector<4x8x8xf32>
    %c0_i32 = arith.constant 0 : i32
    %32 = vector.broadcast %c0_i32 : i32 to vector<1x1x8xi32>
    %33 = arith.cmpi eq, %4, %32 : vector<1x1x8xi32>
    %cst_24 = arith.constant -1.000000e+30 : f32
    %34 = vector.shape_cast %33 : vector<1x1x8xi1> to vector<1x1x8xi1>
    %35 = vector.broadcast %34 : vector<1x1x8xi1> to vector<4x8x8xi1>
    %36 = vector.broadcast %cst_24 : f32 to vector<4x8x8xf32>
    %37 = arith.select %35, %36, %31 : vector<4x8x8xi1>, vector<4x8x8xf32>
    %cst_25 = arith.constant dense<0xFF800000> : vector<4x8xf32>
    %38 = vector.multi_reduction <maximumf>, %37, %cst_25 [2] : vector<4x8x8xf32> to vector<4x8xf32>
    %39 = vector.shape_cast %38 : vector<4x8xf32> to vector<4x8x1xf32>
    %40 = vector.broadcast %39 : vector<4x8x1xf32> to vector<4x8x8xf32>
    %41 = arith.subf %37, %40 : vector<4x8x8xf32>
    %42 = math.exp %41 : vector<4x8x8xf32>
    %cst_26 = arith.constant dense<0.000000e+00> : vector<4x8xf32>
    %43 = vector.multi_reduction <add>, %42, %cst_26 [2] : vector<4x8x8xf32> to vector<4x8xf32>
    %44 = vector.shape_cast %43 : vector<4x8xf32> to vector<4x8x1xf32>
    %45 = tpu.reciprocal %44 {approx = true} : vector<4x8x1xf32> -> vector<4x8x1xf32>
    %46 = vector.broadcast %45 : vector<4x8x1xf32> to vector<4x8x8xf32>
    %47 = arith.mulf %42, %46 : vector<4x8x8xf32>
    %48 = arith.truncf %47 : vector<4x8x8xf32> to vector<4x8x8xbf16>
    "tpu.trace_start"() <{level = 10 : i32, message = "hqk,hkd->hqd"}> : () -> ()
    %cst_27 = arith.constant dense<0.000000e+00> : vector<4x8x8xf32>
    %49 = tpu.matmul %48, %28, %cst_27 {dimension_numbers = #tpu.dot_dimension_numbers<[2], [1], [1], [2], [0, 0, 0, 1, 1, 2], [0], [0]>} : vector<4x8x8xbf16>, vector<4x8x8xbf16>, vector<4x8x8xf32> -> vector<4x8x8xf32>
    "tpu.trace_stop"() : () -> ()
    %50 = tpu.transpose %49, [1, 0, 2] : vector<4x8x8xf32> -> vector<8x4x8xf32>
    %51 = vector.shape_cast %50 : vector<8x4x8xf32> to vector<8x32xf32>
    %52 = arith.truncf %51 : vector<8x32xf32> to vector<8x32xbf16>
    %c0_28 = arith.constant 0 : index
    %c0_29 = arith.constant 0 : index
    %53 = vector.load %arg11[%c0_28, %c0_29] : memref<32x32xbf16, #tpu.memory_space<vmem>>, vector<32x32xbf16>
    %cst_30 = arith.constant dense<0.000000e+00> : vector<8x32xf32>
    %54 = tpu.matmul %52, %53, %cst_30 {dimension_numbers = #tpu.dot_dimension_numbers<[1], [0], [0], [1], [0, 0, 1, 1], [], []>} : vector<8x32xbf16>, vector<32x32xbf16>, vector<8x32xf32> -> vector<8x32xf32>
    %c0_31 = arith.constant 0 : index
    %c0_32 = arith.constant 0 : index
    %55 = vector.load %arg12[%c0_31, %c0_32] : memref<1x32xf32, #tpu.memory_space<vmem>>, vector<1x32xf32>
    %56 = vector.broadcast %55 : vector<1x32xf32> to vector<8x32xf32>
    %57 = arith.addf %54, %56 : vector<8x32xf32>
    %58 = arith.extf %1 : vector<8x32xbf16> to vector<8x32xf32>
    %59 = arith.addf %58, %57 : vector<8x32xf32>
    %cst_33 = arith.constant dense<0.000000e+00> : vector<8xf32>
    %60 = vector.multi_reduction <add>, %59, %cst_33 [1] : vector<8x32xf32> to vector<8xf32>
    %61 = vector.shape_cast %60 : vector<8xf32> to vector<8x1xf32>
    %cst_34 = arith.constant 3.200000e+01 : f32
    %62 = vector.broadcast %cst_34 : f32 to vector<8x1xf32>
    %63 = arith.divf %61, %62 : vector<8x1xf32>
    %64 = vector.broadcast %63 : vector<8x1xf32> to vector<8x32xf32>
    %65 = arith.subf %59, %64 : vector<8x32xf32>
    %66 = arith.mulf %65, %65 : vector<8x32xf32>
    %cst_35 = arith.constant dense<0.000000e+00> : vector<8xf32>
    %67 = vector.multi_reduction <add>, %66, %cst_35 [1] : vector<8x32xf32> to vector<8xf32>
    %68 = vector.shape_cast %67 : vector<8xf32> to vector<8x1xf32>
    %cst_36 = arith.constant 3.100000e+01 : f32
    %69 = vector.broadcast %cst_36 : f32 to vector<8x1xf32>
    %70 = arith.divf %68, %69 : vector<8x1xf32>
    %71 = math.sqrt %70 : vector<8x1xf32>
    %72 = vector.broadcast %63 : vector<8x1xf32> to vector<8x32xf32>
    %73 = arith.subf %59, %72 : vector<8x32xf32>
    %cst_37 = arith.constant 9.99999997E-7 : f32
    %74 = vector.broadcast %cst_37 : f32 to vector<8x1xf32>
    %75 = arith.addf %71, %74 : vector<8x1xf32>
    %76 = math.rsqrt %75 : vector<8x1xf32>
    %77 = vector.broadcast %76 : vector<8x1xf32> to vector<8x32xf32>
    %78 = arith.mulf %73, %77 : vector<8x32xf32>
    %79 = arith.truncf %78 : vector<8x32xf32> to vector<8x32xbf16>
    %c0_38 = arith.constant 0 : index
    %c0_39 = arith.constant 0 : index
    %80 = vector.load %arg13[%c0_38, %c0_39] : memref<32x64xbf16, #tpu.memory_space<vmem>>, vector<32x64xbf16>
    %cst_40 = arith.constant dense<0.000000e+00> : vector<8x64xf32>
    %81 = tpu.matmul %79, %80, %cst_40 {dimension_numbers = #tpu.dot_dimension_numbers<[1], [0], [0], [1], [0, 0, 1, 1], [], []>} : vector<8x32xbf16>, vector<32x64xbf16>, vector<8x64xf32> -> vector<8x64xf32>
    %c0_41 = arith.constant 0 : index
    %c0_42 = arith.constant 0 : index
    %82 = vector.load %arg14[%c0_41, %c0_42] : memref<1x64xf32, #tpu.memory_space<vmem>>, vector<1x64xf32>
    %83 = vector.broadcast %82 : vector<1x64xf32> to vector<8x64xf32>
    %84 = arith.addf %81, %83 : vector<8x64xf32>
    %cst_43 = arith.constant 0.000000e+00 : f32
    %85 = vector.broadcast %cst_43 : f32 to vector<8x64xf32>
    %86 = arith.maximumf %84, %85 : vector<8x64xf32>
    %87 = arith.truncf %86 : vector<8x64xf32> to vector<8x64xbf16>
    %c0_44 = arith.constant 0 : index
    %c0_45 = arith.constant 0 : index
    %88 = vector.load %arg15[%c0_44, %c0_45] : memref<64x32xbf16, #tpu.memory_space<vmem>>, vector<64x32xbf16>
    %cst_46 = arith.constant dense<0.000000e+00> : vector<8x32xf32>
    %89 = tpu.matmul %87, %88, %cst_46 {dimension_numbers = #tpu.dot_dimension_numbers<[1], [0], [0], [1], [0, 0, 1, 1], [], []>} : vector<8x64xbf16>, vector<64x32xbf16>, vector<8x32xf32> -> vector<8x32xf32>
    %c0_47 = arith.constant 0 : index
    %c0_48 = arith.constant 0 : index
    %90 = vector.load %arg16[%c0_47, %c0_48] : memref<1x32xf32, #tpu.memory_space<vmem>>, vector<1x32xf32>
    %91 = vector.broadcast %90 : vector<1x32xf32> to vector<8x32xf32>
    %92 = arith.addf %89, %91 : vector<8x32xf32>
    %93 = arith.addf %78, %92 : vector<8x32xf32>
    %cst_49 = arith.constant dense<0.000000e+00> : vector<8xf32>
    %94 = vector.multi_reduction <add>, %93, %cst_49 [1] : vector<8x32xf32> to vector<8xf32>
    %95 = vector.shape_cast %94 : vector<8xf32> to vector<8x1xf32>
    %cst_50 = arith.constant 3.200000e+01 : f32
    %96 = vector.broadcast %cst_50 : f32 to vector<8x1xf32>
    %97 = arith.divf %95, %96 : vector<8x1xf32>
    %98 = vector.broadcast %97 : vector<8x1xf32> to vector<8x32xf32>
    %99 = arith.subf %93, %98 : vector<8x32xf32>
    %100 = arith.mulf %99, %99 : vector<8x32xf32>
    %cst_51 = arith.constant dense<0.000000e+00> : vector<8xf32>
    %101 = vector.multi_reduction <add>, %100, %cst_51 [1] : vector<8x32xf32> to vector<8xf32>
    %102 = vector.shape_cast %101 : vector<8xf32> to vector<8x1xf32>
    %cst_52 = arith.constant 3.100000e+01 : f32
    %103 = vector.broadcast %cst_52 : f32 to vector<8x1xf32>
    %104 = arith.divf %102, %103 : vector<8x1xf32>
    %105 = math.sqrt %104 : vector<8x1xf32>
    %106 = vector.broadcast %97 : vector<8x1xf32> to vector<8x32xf32>
    %107 = arith.subf %93, %106 : vector<8x32xf32>
    %cst_53 = arith.constant 9.99999997E-7 : f32
    %108 = vector.broadcast %cst_53 : f32 to vector<8x1xf32>
    %109 = arith.addf %105, %108 : vector<8x1xf32>
    %110 = math.rsqrt %109 : vector<8x1xf32>
    %111 = vector.broadcast %110 : vector<8x1xf32> to vector<8x32xf32>
    %112 = arith.mulf %107, %111 : vector<8x32xf32>
    %113 = arith.truncf %112 : vector<8x32xf32> to vector<8x32xbf16>
    %c0_54 = arith.constant 0 : index
    %c0_55 = arith.constant 0 : index
    %c0_56 = arith.constant 0 : index
    %114 = vector.load %arg17[%c0_54, %c0_55, %c0_56] : memref<1x8x32xbf16, #tpu.memory_space<vmem>>, vector<1x8x32xbf16>
    %115 = vector.shape_cast %114 : vector<1x8x32xbf16> to vector<8x32xbf16>
    %116 = vector.shape_cast %113 : vector<8x32xbf16> to vector<1x8x32xbf16>
    tpu.vector_store %arg17[%c0_54, %c0_55, %c0_56], %116 {strides = array<i32>} : memref<1x8x32xbf16, #tpu.memory_space<vmem>>, vector<1x8x32xbf16>,
    return
  }
  func.func @transform_0(%arg0: i32, %arg1: i32) -> (i32, i32, i32) {
    %c0_i32 = arith.constant 0 : i32
    %c0_i32_0 = arith.constant 0 : i32
    return %arg0, %arg1, %c0_i32 : i32, i32, i32
  }
  func.func @transform_1(%arg0: i32, %arg1: i32) -> (i32, i32, i32) {
    %c0_i32 = arith.constant 0 : i32
    %c0_i32_0 = arith.constant 0 : i32
    %c0_i32_1 = arith.constant 0 : i32
    return %arg0, %c0_i32, %c0_i32_0 : i32, i32, i32
  }
  func.func @transform_2(%arg0: i32, %arg1: i32) -> (i32, i32, i32) {
    %c0_i32 = arith.constant 0 : i32
    %c0_i32_0 = arith.constant 0 : i32
    %c0_i32_1 = arith.constant 0 : i32
    return %arg0, %c0_i32, %c0_i32_0 : i32, i32, i32
  }
  func.func @transform_3(%arg0: i32, %arg1: i32) -> (i32, i32) {
    %c0_i32 = arith.constant 0 : i32
    %c0_i32_0 = arith.constant 0 : i32
    %c0_i32_1 = arith.constant 0 : i32
    return %c0_i32, %c0_i32_0 : i32, i32
  }
  func.func @transform_4(%arg0: i32, %arg1: i32) -> (i32, i32) {
    %c0_i32 = arith.constant 0 : i32
    %c0_i32_0 = arith.constant 0 : i32
    %c0_i32_1 = arith.constant 0 : i32
    return %c0_i32, %c0_i32_0 : i32, i32
  }
  func.func @transform_5(%arg0: i32, %arg1: i32) -> (i32, i32) {
    %c0_i32 = arith.constant 0 : i32
    %c0_i32_0 = arith.constant 0 : i32
    %c0_i32_1 = arith.constant 0 : i32
    return %c0_i32, %c0_i32_0 : i32, i32
  }
  func.func @transform_6(%arg0: i32, %arg1: i32) -> (i32, i32) {
    %c0_i32 = arith.constant 0 : i32
    %c0_i32_0 = arith.constant 0 : i32
    %c0_i32_1 = arith.constant 0 : i32
    return %c0_i32, %c0_i32_0 : i32, i32
  }
  func.func @transform_7(%arg0: i32, %arg1: i32) -> (i32, i32) {
    %c0_i32 = arith.constant 0 : i32
    %c0_i32_0 = arith.constant 0 : i32
    %c0_i32_1 = arith.constant 0 : i32
    return %c0_i32, %c0_i32_0 : i32, i32
  }
  func.func @transform_8(%arg0: i32, %arg1: i32) -> (i32, i32) {
    %c0_i32 = arith.constant 0 : i32
    %c0_i32_0 = arith.constant 0 : i32
    %c0_i32_1 = arith.constant 0 : i32
    return %c0_i32, %c0_i32_0 : i32, i32
  }
  func.func @transform_9(%arg0: i32, %arg1: i32) -> (i32, i32) {
    %c0_i32 = arith.constant 0 : i32
    %c0_i32_0 = arith.constant 0 : i32
    %c0_i32_1 = arith.constant 0 : i32
    return %c0_i32, %c0_i32_0 : i32, i32
  }
  func.func @transform_10(%arg0: i32, %arg1: i32) -> (i32, i32) {
    %c0_i32 = arith.constant 0 : i32
    %c0_i32_0 = arith.constant 0 : i32
    %c0_i32_1 = arith.constant 0 : i32
    return %c0_i32, %c0_i32_0 : i32, i32
  }
  func.func @transform_11(%arg0: i32, %arg1: i32) -> (i32, i32) {
    %c0_i32 = arith.constant 0 : i32
    %c0_i32_0 = arith.constant 0 : i32
    %c0_i32_1 = arith.constant 0 : i32
    return %c0_i32, %c0_i32_0 : i32, i32
  }
  func.func @transform_12(%arg0: i32, %arg1: i32) -> (i32, i32) {
    %c0_i32 = arith.constant 0 : i32
    %c0_i32_0 = arith.constant 0 : i32
    %c0_i32_1 = arith.constant 0 : i32
    return %c0_i32, %c0_i32_0 : i32, i32
  }
  func.func @transform_13(%arg0: i32, %arg1: i32) -> (i32, i32) {
    %c0_i32 = arith.constant 0 : i32
    %c0_i32_0 = arith.constant 0 : i32
    %c0_i32_1 = arith.constant 0 : i32
    return %c0_i32, %c0_i32_0 : i32, i32
  }
  func.func @transform_14(%arg0: i32, %arg1: i32) -> (i32, i32) {
    %c0_i32 = arith.constant 0 : i32
    %c0_i32_0 = arith.constant 0 : i32
    %c0_i32_1 = arith.constant 0 : i32
    return %c0_i32, %c0_i32_0 : i32, i32
  }
  func.func @transform_15(%arg0: i32, %arg1: i32) -> (i32, i32, i32) {
    %c0_i32 = arith.constant 0 : i32
    %c0_i32_0 = arith.constant 0 : i32
    return %arg0, %arg1, %c0_i32 : i32, i32, i32
  }
}

</mosaic_0001>

<bundles_post_ra>
// kernel: tpu_custom_call.1
= control target key start
LH: loop header
LB: loop body
LE: loop exit
PB: predicated region body
PF: predicated region fallthrough
CT: control target
= control target key end

     0   :  { %s3335_s0 = inlined_call_operand.hbm [shape: bf16[2,8,32], index: 0, kind: input, shape index: {}]   ;;  %s3336_s1 = inlined_call_operand.hbm [shape: bf16[2,8,32], index: 1, kind: input, shape index: {}]   ;;  %s3337_s2 = inlined_call_operand.vmem [shape: s32[2,1,8], index: 2, kind: input, shape index: {}]   ;;  %s3338_s3 = inlined_call_operand.vmem [shape: bf16[32,32], index: 3, kind: input, shape index: {}]   ;;  %s3339_s4 = inlined_call_operand.vmem [shape: f32[1,32], index: 4, kind: input, shape index: {}]   ;;  %s3340_s5 = inlined_call_operand.vmem [shape: bf16[32,32], index: 5, kind: input, shape index: {}]   ;;  %s3341_s6 = inlined_call_operand.vmem [shape: f32[1,32], index: 6, kind: input, shape index: {}]   ;;  %s3342_s7 = inlined_call_operand.vmem [shape: bf16[32,32], index: 7, kind: input, shape index: {}]   ;;  %s3343_s8 = inlined_call_operand.vmem [shape: f32[1,32], index: 8, kind: input, shape index: {}]   ;;  %s3344_s9 = inlined_call_operand.hbm [shape: bf16[32,32], index: 9, kind: input, shape index: {}]   ;;  %s3345_s10 = inlined_call_operand.vmem [shape: f32[1,32], index: 10, kind: input, shape index: {}]   ;;  %s3346_s11 = inlined_call_operand.hbm [shape: bf16[32,64], index: 11, kind: input, shape index: {}]   ;;  %s3347_s12 = inlined_call_operand.vmem [shape: f32[1,64], index: 12, kind: input, shape index: {}]   ;;  %s3348_s13 = inlined_call_operand.vmem [shape: bf16[64,32], index: 13, kind: input, shape index: {}]   ;;  %s3349_s14 = inlined_call_operand.vmem [shape: f32[1,32], index: 14, kind: input, shape index: {}]   ;;  %s3350_s15 = inlined_call_operand.hbm [shape: bf16[2,8,32], index: 15, kind: output, shape index: {}]  }
   0x1   :  { %3358 = sst [smem:[#allocation20_spill]] %s3335_s0 }
   0x2   :  { %3359 = sst [smem:[#allocation21_spill]] %s3336_s1 }
   0x3   :  { %3360 = sst [smem:[#allocation22_spill]] %s3344_s9 }
   0x4   :  { %3361 = sst [smem:[#allocation23_spill]] %s3345_s10 }
   0x5   :  { %3362 = sst [smem:[#allocation24_spill]] %s3346_s11 }
   0x6   :  { %3363 = sst [smem:[#allocation25_spill]] %s3347_s12 }
   0x7   :  { %3364 = sst [smem:[#allocation26_spill]] %s3348_s13 }
   0x8   :  { %3365 = sst [smem:[#allocation27_spill]] %s3349_s14 }
   0x9   :  { %3366 = sst [smem:[#allocation28_spill]] %s3350_s15 }
   0xa   :  { %20 = vsyncpa [#allocation3], 0 }
   0xb   :  { %22 = vsyncpa [#allocation3 + $0x1], 0 }
   0xc   :  { %23 = vsyncpa [#allocation6], 0 }
   0xd   :  { %25 = vsyncpa [#allocation6 + $0x1], 0 }
   0xe   :  { %26 = vsyncpa [#allocation9], 0 }
   0xf   :  { %27 = vsyncpa [#allocation4], 0 }
  0x10   :  { %29 = vsyncpa [#allocation4 + $0x1], 0  ;;  %s2893_s18 = smov 0   ;;  %s2895_s19 = smov 0  }
  0x11   :  { %s2897_s20 = smov 0   ;;  %s2899_s21 = smov 0  }
  0x12   :  { %s2901_s22 = smov 0   ;;  %s2903_s23 = smov 0  }
  0x13 LB: > { %3367 = sst [smem:[#allocation16_spill]] %s2773_s18  ;;  %s2924_s24 = sadd.s32 4294967295, %s2793_s23   ;;  %s2793_s23 = sphi %s2903_s23, %s35_s23   ;;  %s2789_s22 = sphi %s2901_s22, %s3396_s22   ;;  %s2785_s21 = sphi %s2899_s21, %s3395_s21   ;;  %s2781_s20 = sphi %s2897_s20, %s3399_s20   ;;  %s2777_s19 = sphi %s2895_s19, %s3398_s19   ;;  %s2773_s18 = sphi %s2893_s18, %s3397_s18  }
  0x14   : > { %3368 = sst [smem:[#allocation17_spill]] %s2789_s22  ;;  %s2257_s25 = sadd.s32 4294967294, %s2793_s23  }
  0x15   : > { %p69_p0 = scmp.ne.s32.totalorder %s2777_s19, %s2773_s18  ;;  %p3354_p1 = scmp.eq.s32.totalorder %s2924_s24, 0 }
  0x16   : > { %p405_p3 = scmp.eq.s32.totalorder %s2257_s25, 1  ;;  %p2258_p5 = scmp.ge.s32.totalorder %s2793_s23, 1 }
  0x17   : > { %p2933_p4 = por %p3354_p1, %p69_p0  ;;  %p412_p7 = scmp.lt.s32.totalorder %s2793_s23, 3 }
  0x18   : > { %p2938_p6 = por %p405_p3, %p69_p0  ;;  %s2795_s29 = smov [#allocation7]  }
  0x19   : > { %p2943_p8 = pnand %p2258_p5, %p412_p7  ;;  %s442_s30 = sshll.u32 %s2795_s29, 4  ;;  %s443_s30 = int_to_ptr.vmem [resolvable:$true] %s442_s30 }
  0x1a   : > { %s3370_s27 = scalar_select %p2938_p6, 1, 0 }
  0x1b   : > { %p2468_p9 = pneg %p2943_p8  ;;  %s2796_s17 = smov [#allocation8]  }
  0x1c   : > { %3371 = sst [smem:[#allocation18_spill]] %s3370_s27  ;;  %s458_s25 = sshll.u32 %s2796_s17, 4  ;;  %s459_s25 = int_to_ptr.vmem [resolvable:$true] %s458_s25 }
  0x1d   : > { %p2952_p11 = pnand %p2468_p9, %p3354_p1  ;;  %s2604_s27 = scalar_lea.vmem %s443_s30, 256 }
  0x1e   : > { %p2605_p13 = scmp.ne.s32.totalorder %s443_s30, %s2604_s27  ;;  %p2612_p5 = scmp.lt.s32.totalorder %s443_s30, %s443_s30 }
  0x1f   : > { %p2595_p12 = pneg %p2952_p11  ;;  %p2613_p7 = scmp.lt.s32.totalorder %s2604_s27, %s2604_s27 }
  0x21   : > { %p2607_p0 = pnand %p2605_p13, %p2595_p12  ;;  %p2614_p10 = por %p2613_p7, %p2612_p5 }
  0x23   : > { %p2608_p3 = pneg %p2607_p0 }
  0x25   : > { %p2615_p9 = pnand %p2614_p10, %p2608_p3 }
  0x27   : > { %2618 = shalt.err (!%p2615_p9)
}
  0x28   : > { %s2797_s29 = smov 64   ;;  %s2798_s18 = smov 4  }
  0x29   : > { %s3374_s9 = sld [smem:[#allocation22_spill]]  ;;  %s2630_s14 = scalar_lea.vmem %s459_s25, 256 }
  0x2a   : > { %p2631_p1 = scmp.ne.s32.totalorder %s459_s25, %s2630_s14  ;;  %p2638_p2 = scmp.lt.s32.totalorder %s459_s25, %s459_s25 }
  0x2b   : > { %p2639_p6 = scmp.lt.s32.totalorder %s2630_s14, %s2630_s14 }
  0x2c   : > { %p2633_p13 = pnand %p2631_p1, %p2595_p12 }
  0x2d   : > { %p2640_p5 = por %p2639_p6, %p2638_p2 }
  0x2e   : > { %p2634_p0 = pneg %p2633_p13 }
  0x2f   : > { %2471 = dma.hbm_to_vmem [thread:$0]  (!%p2952_p11), %s3374_s9, 256, %s443_s30, [#allocation6], %s2797_s29, %s2797_s29, %s2798_s18  }
  0x30   : > { %p2641_p10 = pnand %p2640_p5, %p2634_p0 }
  0x32   : > { %2644 = shalt.err (!%p2641_p10)
}
  0x33   : > { %s3375_s11 = sld [smem:[#allocation24_spill]]  ;;  %s47_s14 = sadd.s32 1, %s2789_s22 }
  0x34   : > { %s56_s15 = sadd.s32 1, %s2781_s20  ;;  %p49_p1 = scmp.ge.s32.totalorder %s47_s14, 2 }
  0x35   : > { %p63_p2 = scmp.ne.s32.totalorder %s2781_s20, %s2777_s19  ;;  %p64_p6 = scmp.eq.s32.totalorder %s2793_s23, 0 }
  0x36   : > { %p2488_p12 = scmp.lt.s32.totalorder %s2793_s23, 2  ;;  %s3401_s14 = smov (%p49_p1, %s47_s14), 0 }
  0x37   : > { %3376 = sst [smem:[#allocation19_spill]] %s3401_s14  ;;  %p65_p3 = por %p64_p6, %p63_p2 }
  0x38   : > { %p3377_p7 = scmp.eq.s32.totalorder %s2924_s24, 1  ;;  %s51_s30 = ssub.s32 %s2789_s22, %s3401_s14 }
  0x39   : > { %2474 = dma.hbm_to_vmem [thread:$0]  (!%p2952_p11), %s3375_s11, 256, %s459_s25, [#allocation9], %s2797_s29, %s2797_s29, %s2798_s18  }
  0x3a   : > { %p2984_p9 = por %p3377_p7, %p63_p2  ;;  %s481_s16 = sand.u32 1, %s2781_s20  }
  0x3b   : > { %p54_p13 = scmp.eq.s32.totalorder %s51_s30, 0  ;;  %s2262_s18 = sshll.u32 %s481_s16, 2 }
  0x3c   : > { %s2263_s25 = sshll.u32 %s2789_s22, 6  ;;  %s3379_s0 = sld [smem:[#allocation20_spill]] }
  0x3d   : > { %s2993_s29 = scalar_select %p54_p13, %s2781_s20, %s56_s15  }
  0x3e   : > { %s485_s11 = scalar_lea.vmem [#allocation2], %s2262_s18  ;;  %p3000_p11 = pnand %p2488_p12, %p65_p3 }
  0x3f   : > { %s493_s13 = sshll.u32 %s485_s11, 4  ;;  %s3381_s1 = sld [smem:[#allocation21_spill]]  ;;  %s494_s13 = int_to_ptr.vmem [resolvable:$true] %s493_s13 }
  0x40   : > { %s482_s15 = scalar_lea.sflag [#allocation3], %s481_s16  ;;  %p2647_p0 = pneg %p3000_p11 }
  0x41   : > { %s2658_s17 = scalar_lea.vmem %s494_s13, 64  ;;  %s2799_s11 = smov [#allocation2]  }
  0x42   : > { %s491_s9 = scalar_lea.hbm %s3379_s0, %s2263_s25  ;;  %p2659_p5 = scmp.ne.s32.totalorder %s494_s13, %s2658_s17 }
  0x43   : > { %s2663_s27 = sshll.u32 %s2799_s11, 4  ;;  %s2664_s27 = int_to_ptr.vmem [resolvable:$false] %s2663_s27 }
  0x44   : > { %p2661_p10 = pnand %p2659_p5, %p2647_p0  ;;  %s2665_s0 = scalar_lea.vmem %s2664_s27, 128 }
  0x45   : > { %s3007_s22 = scalar_lea.hbm %s3381_s1, %s2263_s25  ;;  %p2666_p2 = scmp.lt.s32.totalorder %s494_s13, %s2664_s27 }
  0x46   : > { %p2662_p1 = pneg %p2661_p10  ;;  %p2667_p6 = scmp.lt.s32.totalorder %s2665_s0, %s2658_s17 }
  0x48   : > { %p2668_p12 = por %p2667_p6, %p2666_p2 }
  0x4a   : > { %p2669_p3 = pnand %p2668_p12, %p2662_p1 }
  0x4c   : > { %2672 = shalt.err (!%p2669_p3)
}
  0x4d   : > { %2478 = dma.hbm_to_vmem [thread:$0]  (!%p3000_p11), %s491_s9, 64, %s494_s13, %s482_s15  }
  0x4e   : > { %s500_s14 = sand.u32 1, %s2793_s23   ;;  %s504_s16 = scalar_lea.vmem [#allocation5], %s2262_s18 }
  0x4f   : > { %s511_s25 = sshll.u32 %s504_s16, 4  ;;  %s501_s30 = scalar_lea.sflag [#allocation6], %s500_s14  ;;  %s512_s25 = int_to_ptr.vmem [resolvable:$true] %s511_s25 }
  0x50   : > { %s2686_s1 = scalar_lea.vmem %s512_s25, 64  ;;  %s2800_s0 = smov [#allocation5]  }
  0x51   : > { %p2687_p7 = scmp.ne.s32.totalorder %s512_s25, %s2686_s1  ;;  %s2691_s17 = sshll.u32 %s2800_s0, 4  ;;  %s2692_s17 = int_to_ptr.vmem [resolvable:$false] %s2691_s17 }
  0x52   : > { %s2693_s11 = scalar_lea.vmem %s2692_s17, 128  ;;  %p2694_p10 = scmp.lt.s32.totalorder %s512_s25, %s2692_s17 }
  0x53   : > { %p2689_p13 = pnand %p2687_p7, %p2647_p0  ;;  %p2695_p1 = scmp.lt.s32.totalorder %s2693_s11, %s2686_s1 }
  0x55   : > { %p2690_p5 = pneg %p2689_p13  ;;  %p2696_p2 = por %p2695_p1, %p2694_p10 }
  0x57   : > { %p2697_p6 = pnand %p2696_p2, %p2690_p5 }
  0x59   : > { %2700 = shalt.err (!%p2697_p6)
}
  0x5a   : > { %2481 = dma.hbm_to_vmem [thread:$0]  (!%p3000_p11), %s3007_s22, 64, %s512_s25, %s501_s30  }
  0x5b   : > { %526 = sbr.rel (%p2943_p8) target bundleno = 2609 (0xa31), region = 80  ;;  %s3026_s9 = sand.u32 (!%p2943_p8), 1, %s2777_s19  }
  0x5c   : > { %s3029_s13 = sshll.u32 (!%p2943_p8), %s3026_s9, 2  ;;  %s529_s1 = scalar_lea.sflag (!%p2943_p8), [#allocation3], %s3026_s9 }
  0x5d   : > { %s532_s18 = scalar_lea.vmem (!%p2943_p8), [#allocation2], %s3029_s13 }
  0x60   : > { %2752 = dma.done.wait (%p2933_p4), %s529_s1, 64  }
  0x61   : > { %2754 = vsyncadd (%p2933_p4), %s529_s1, 4294967232  ;;  %s537_s10 = sand.u32 1, %s2924_s24   ;;  %s541_s28 = scalar_lea.vmem [#allocation5], %s3029_s13 }
  0x62   : > { %s538_s22 = scalar_lea.sflag [#allocation6], %s537_s10 }
  0x63   : > { %2756 = dma.done.wait (%p2933_p4), %s538_s22, 64  }
  0x64   : > { %2758 = vsyncadd (%p2933_p4), %s538_s22, 4294967232  ;;  %p3382_p8 = scmp.eq.s32.totalorder %s2924_s24, 0 }
  0x66   : > { %2760 = dma.done.wait (%p3382_p8), [#allocation6], 256   ;;  %p3383_p11 = pmov %p3382_p8 }
  0x67   : > { %p3384_p0 = pmov %p3382_p8 }
  0x68   : > { %2762 = vsyncadd (%p3383_p11), [#allocation6], 4294967040 }
  0x69   : > { %2764 = dma.done.wait (%p3384_p0), [#allocation9], 256   ;;  %p3385_p12 = pmov %p3384_p0 }
  0x6a   : > { %v2801_v0 = vmov 0.0   ;;  %vm2802_vm0 = vmmov 0   ;;  %v2555_v1 = vld [vmem:[%s3340_s5 + $0x8] sm:$0xff]   ;;  %v2557_v3 = vld [vmem:[%s3340_s5] sm:$0xff]   ;;  %vm634_vm1 = vcmask 261120   ;;  %s2803_s22 = smov 104   ;;  %v822_v23 = vlaneseq }
  0x6b   : > { %2766 = vsyncadd (%p3385_p12), [#allocation9], 4294967040  ;;  %2362 = vmatprep.subr.bf16.mxu1 %v2801_v0  ;;  %2354 = vmatprep.subr.bf16.mxu0 %v2801_v0  ;;  %v2556_v2 = vld [vmem:[%s3338_s3 + $0x8] sm:$0xff]   ;;  %v2558_v4 = vld [vmem:[%s3338_s3] sm:$0xff]   ;;  %s2805_s27 = smov 112   ;;  %vm1257_vm2 = vcmask 64512  }
  0x6c   : > { %2366 = vmatprep.mubr.msk.bf16.mxu1 %vm2802_vm0, %v2801_v0  ;;  %2358 = vmatprep.mubr.msk.bf16.mxu0 %vm2802_vm0, %v2801_v0  ;;  %v609_v5 = vld [vmem:[%s541_s28] sm:$0xf]  ;;  %v3071_v6 = vld [vmem:[%s532_s18] sm:$0xf]  ;;  %s2804_s28 = smov 120   ;;  %v3105_v27 = vshrl.u32 %v822_v23, 7 }
  0x6d   : > { %2363 = vmatpush3.bf16.msra.mxu1 %v2555_v1  ;;  %2355 = vmatpush3.bf16.msra.mxu0 %v2556_v2  ;;  %v2276_v7 = vld [vmem:[%s3341_s6] ss:$0 sm:$0xff]  ;;  %v2559_v10 = vld [vmem:[%s3342_s7 + $0x8] sm:$0xff]   ;;  %v2806_v21 = vmov 1983009808   ;;  %p604_p4 = scmp.lt.s32.totalorder %s2785_s21, 1 }
  0x6e   : > { %2364 = vmatprep.subr.bf16.mxu1 %v2801_v0  ;;  %2356 = vmatprep.subr.bf16.mxu0 %v2801_v0  ;;  %v2272_v9 = vld [vmem:[%s3339_s4] ss:$0 sm:$0xff]  ;;  %v820_v22 = vunpack.c.l.s4 %v2806_v21  ;;  %v2807_v24 = vmov 1934713408   ;;  %vm1508_vm5 = vcmask 1043456   ;;  %s2809_s17 = smov 16  }
  0x6f   : > { %v2560_v17 = vld [vmem:[%s3342_s7] sm:$0xff]   ;;  %v852_v25 = vunpack.c.l.s4 %v2807_v24  ;;  %s605_s14 = scalar_select %p604_p4, %s2785_s21, 1  ;;  %vm1839_vm6 = vcmask 130048   ;;  %vm1841_vm7 = vcmask 195584   ;;  %vm2042_vm10 = vcmask 523264  }
  0x70   : > { %v821_v26 = vunpack.c.0.s8 %v820_v22  ;;  %s2810_s11 = smov 8   ;;  %s2811_s1 = smov 24   ;;  %vm2108_vm13 = vcmask 257024  }
  0x71   : > { %2365 = vmatpush3.bf16.msra.mxu1 %v2557_v3  ;;  %2357 = vmatpush3.bf16.msra.mxu0 %v2558_v4  ;;  %v853_v30 = vunpack.c.0.s8 %v852_v25  ;;  %s606_s25 = scalar_lea.vmem %s3337_s2, %s605_s14  ;;  %s3387_s15 = sld [smem:[#allocation26_spill]] }
  0x72   : > { %2378 = vmatprep.subr.bf16.mxu1 %v2801_v0  ;;  %2370 = vmatprep.subr.bf16.mxu0 %v2801_v0  ;;  %v3108_v31 = vsub.s32 %v821_v26, %v3105_v27  ;;  %s3389_s10 = sld [smem:[#allocation27_spill]]  ;;  %s2812_s0 = smov [#allocation10]  }
  0x73   : > { %v3111_v38 = vsub.s32 %v853_v30, %v3105_v27  ;;  %s3390_s24 = sld [smem:[#allocation28_spill]] }
  0x74   : > { %2367 = vmatmul.mubr.msk.bf16.vlgmr.msra.gmra.mxu1 %vm634_vm1, %v609_v5  ;;  %2359 = vmatmul.mubr.msk.bf16.vlgmr.msra.gmra.mxu0 %vm634_vm1, %v3071_v6 }
  0x75   : > { %2380 = vmatprep.mubr.msk.bf16.mxu1 %vm2802_vm0, %v2801_v0  ;;  %2374 = vmatprep.mubr.msk.bf16.mxu0 %vm2802_vm0, %v2801_v0 }
  0x76   : > { %2371 = vmatpush3.bf16.msra.mxu0 %v2559_v10 }
  0x77   : > { %2372 = vmatprep.subr.bf16.mxu0 %v2801_v0 }
  0x7a   : > { %2373 = vmatpush3.bf16.msra.mxu0 %v2560_v17 }
  0x7b   : > { %2384 = vmatprep.subr.bf16.mxu0 %v2801_v0 }
  0x7d   : > { %2375 = vmatmul.mubr.msk.bf16.vlgmr.msra.gmra.mxu0 %vm634_vm1, %v609_v5 }
  0x7e   : > { %2386 = vmatprep.mubr.msk.bf16.mxu0 %vm2802_vm0, %v2801_v0 }
 0x134   : > { %v738_v8 = vpop.f32.mrf.mxu1  ;;  %v672_v12 = vpop.f32.mrf.mxu0 }
 0x135   : > { %v739_v11 = vadd.f32 %v2276_v7, %v738_v8  ;;  %v673_v14 = vadd.f32 %v2272_v9, %v672_v12 }
 0x136   : > { %v2368_v13 = vpop.f32.mrf.mxu1  ;;  %v2360_v15 = vpop.f32.mrf.mxu0 }
 0x137   : > { %964 = vrot.lane.b32.xlu1 %v739_v11, %s2803_s22  ;;  %958 = vrot.lane.b32.xlu0 %v739_v11, %s2804_s28 }
 0x138   : > { %v741_v16 = vpop.f32.mrf.mxu1  ;;  %v675_v18 = vpop.f32.mrf.mxu0 }
 0x13a   : > { %v2369_v19 = vpop.f32.mrf.mxu1  ;;  %v2361_v20 = vpop.f32.mrf.mxu0 }
 0x13b   : > { %961 = vrot.lane.b32.xlu0 %v739_v11, %s2805_s27  ;;  %808 = vrot.lane.b32.xlu1 %v673_v14, %s2804_s28 }
 0x13f   : > { %811 = vrot.lane.b32.xlu0 %v673_v14, %s2805_s27  ;;  %814 = vrot.lane.b32.xlu1 %v673_v14, %s2803_s22 }
 0x1a9   : > { %v965_v28 = vpop.permute.xlu1 %964  ;;  %v959_v29 = vpop.permute.xlu0 %958 }
 0x1aa   : > { %v983_v32 = vcombine.low %v959_v29, %v965_v28  ;;  %v984_v33 = vcombine.high %v959_v29, %v965_v28 }
 0x1ac   : > { %v991_v39 = vrot.slane %v983_v32, %v3108_v31  ;;  %v998_v40 = vrot.slane %v984_v33, %v3108_v31 }
 0x1ad   : > { %v962_v34 = vpop.permute.xlu0 %961  ;;  %v809_v35 = vpop.permute.xlu1 %808 }
 0x1ae   : > { %v967_v36 = vcombine.low %v739_v11, %v962_v34  ;;  %v968_v37 = vcombine.high %v739_v11, %v962_v34 }
 0x1b0   : > { %v975_v41 = vrot.slane %v967_v36, %v3108_v31  ;;  %v982_v42 = vrot.slane %v968_v37, %v3108_v31 }
 0x1b1   : > { %v812_v43 = vpop.permute.xlu0 %811  ;;  %v815_v44 = vpop.permute.xlu1 %814 }
 0x1b2   : > { %v999_v45 = vcombine.low %v975_v41, %v991_v39  ;;  %v1000_v46 = vcombine.high %v975_v41, %v991_v39  ;;  %v1015_v47 = vcombine.low %v982_v42, %v998_v40  ;;  %v1016_v48 = vcombine.high %v982_v42, %v998_v40 }
 0x1b3   : > { %v817_v49 = vcombine.low %v673_v14, %v812_v43  ;;  %v818_v50 = vcombine.high %v673_v14, %v812_v43  ;;  %v833_v51 = vcombine.low %v809_v35, %v815_v44  ;;  %v834_v52 = vcombine.high %v809_v35, %v815_v44 }
 0x1b4   : > { %v1007_v53 = vrot.slane %v999_v45, %v3111_v38  ;;  %v1014_v54 = vrot.slane %v1000_v46, %v3111_v38  ;;  %v1023_v55 = vrot.slane %v1015_v47, %v3111_v38  ;;  %v1030_v56 = vrot.slane %v1016_v48, %v3111_v38 }
 0x1b5   : > { %v825_v57 = vrot.slane %v817_v49, %v3108_v31  ;;  %v832_v58 = vrot.slane %v818_v50, %v3108_v31  ;;  %v841_v59 = vrot.slane %v833_v51, %v3108_v31  ;;  %v848_v60 = vrot.slane %v834_v52, %v3108_v31 }
 0x1b6   : > { %v1035_v61 = vcombine.low %v1007_v53, %v1014_v54  ;;  %v2286_v62 = vcombine.high %v1007_v53, %v1014_v54  ;;  %v1051_v63 = vcombine.low %v1023_v55, %v1030_v56  ;;  %v2287_v1 = vcombine.high %v1023_v55, %v1030_v56 }
 0x1b7   : > { %v849_v2 = vcombine.low %v825_v57, %v841_v59  ;;  %v850_v3 = vcombine.high %v825_v57, %v841_v59  ;;  %v865_v4 = vcombine.low %v832_v58, %v848_v60  ;;  %v866_v5 = vcombine.high %v832_v58, %v848_v60 }
 0x1b8   : > { %v1042_v7 = vrot.slane %v1035_v61, %v3108_v31  ;;  %v1050_v8 = vrot.slane %v2286_v62, %v3108_v31  ;;  %v1058_v9 = vrot.slane %v1051_v63, %v3108_v31  ;;  %v1066_v10 = vrot.slane %v2287_v1, %v3108_v31  ;;  %v801_v62 = vpop.f32.mrf.mxu0 }
 0x1b9   : > { %v857_v11 = vrot.slane %v849_v2, %v3111_v38  ;;  %v864_v12 = vrot.slane %v850_v3, %v3111_v38  ;;  %v873_v13 = vrot.slane %v865_v4, %v3111_v38  ;;  %v880_v14 = vrot.slane %v866_v5, %v3111_v38  ;;  %v610_v3 = vld [vmem:[%s606_s25] sm:$0x1]  ;;  %s2111_s25 = scalar_lea.sflag [#allocation4], %s3026_s9 }
 0x1ba   : > { %v1067_v15 = vcombine.low %v1042_v7, %v1050_v8  ;;  %v1083_v16 = vcombine.low %v1058_v9, %v1066_v10  ;;  %v1068_v17 = vcombine.high %v1042_v7, %v1050_v8  ;;  %v1084_v18 = vcombine.high %v1058_v9, %v1066_v10  ;;  %v2376_v63 = vpop.f32.mrf.mxu0 }
 0x1bb   : > { %v885_v19 = vcombine.low %v857_v11, %v864_v12  ;;  %v2284_v20 = vcombine.high %v857_v11, %v864_v12  ;;  %v901_v21 = vcombine.low %v873_v13, %v880_v14  ;;  %v2285_v22 = vcombine.high %v873_v13, %v880_v14 }
 0x1bc   : > { %v1075_v23 = vrot.slane %v1067_v15, %v3111_v38  ;;  %v1091_v24 = vrot.slane %v1083_v16, %v3111_v38  ;;  %v1082_v33 = vrot.slane %v1068_v17, %v3111_v38  ;;  %v1098_v34 = vrot.slane %v1084_v18, %v3111_v38  ;;  %v804_v1 = vpop.f32.mrf.mxu0 }
 0x1bd   : > { %v892_v25 = vrot.slane %v885_v19, %v3108_v31  ;;  %v900_v26 = vrot.slane %v2284_v20, %v3108_v31  ;;  %v908_v28 = vrot.slane %v901_v21, %v3108_v31  ;;  %v916_v29 = vrot.slane %v2285_v22, %v3108_v31 }
 0x1be   : > { %v1099_v30 = vcombine.low %v1075_v23, %v1091_v24  ;;  %v1100_v32 = vcombine.high %v1075_v23, %v1091_v24  ;;  %v1101_v44 = vcombine.low %v1082_v33, %v1098_v34  ;;  %v1102_v45 = vcombine.high %v1082_v33, %v1098_v34  ;;  %v2377_v2 = vpop.f32.mrf.mxu0 }
 0x1bf   : > { %v917_v35 = vcombine.low %v892_v25, %v900_v26  ;;  %v933_v36 = vcombine.low %v908_v28, %v916_v29  ;;  %v918_v46 = vcombine.high %v892_v25, %v900_v26  ;;  %v934_v47 = vcombine.high %v908_v28, %v916_v29 }
 0x1c0   : > { %v1103_v37 = vpack.c.bf16 %v1099_v30, %v1099_v30  ;;  %v1104_v39 = vpack.c.bf16 %v1100_v32, %v1100_v32  ;;  %v1105_v50 = vpack.c.bf16 %v1101_v44, %v1101_v44  ;;  %v1106_v51 = vpack.c.bf16 %v1102_v45, %v1102_v45 }
 0x1c1   : > { %v925_v40 = vrot.slane %v917_v35, %v3111_v38  ;;  %v941_v41 = vrot.slane %v933_v36, %v3111_v38  ;;  %v932_v54 = vrot.slane %v918_v46, %v3111_v38  ;;  %v948_v55 = vrot.slane %v934_v47, %v3111_v38 }
 0x1c2   : > { %v1262_v42 = vsel %vm1257_vm2, %v1103_v37, 0  ;;  %v1308_v43 = vsel %vm1257_vm2, %v1104_v39, 0  ;;  %v1354_v56 = vsel %vm1257_vm2, %v1105_v50, 0  ;;  %v1400_v57 = vsel %vm1257_vm2, %v1106_v51, 0  ;;  %v2280_v39 = vld [vmem:[%s3343_s8] ss:$0 sm:$0xff] }
 0x1c3   : > { %2379 = vmatpush3.bf16.xpose.msra.mxu1 %v1262_v42  ;;  %2385 = vmatpush3.bf16.xpose.msra.mxu0 %v1308_v43  ;;  %v949_v48 = vcombine.low %v925_v40, %v941_v41  ;;  %v950_v49 = vcombine.high %v925_v40, %v941_v41  ;;  %v951_v58 = vcombine.low %v932_v54, %v948_v55  ;;  %vm1446_vm3 = vcmp.eq.s32.totalorder %v610_v3, 0 }
 0x1c4   : > { %2390 = vmatprep.subr.bf16.mxu1 %v2801_v0  ;;  %2396 = vmatprep.subr.bf16.mxu0 %v2801_v0  ;;  %v952_v59 = vcombine.high %v932_v54, %v948_v55  ;;  %v1450_v4 = vsub.s32 0, %v3105_v27  ;;  %v2808_v5 = vmov 0   ;;  %v802_v40 = vadd.f32 %v2280_v39, %v801_v62 }
 0x1c5   : > { %v953_v52 = vpack.c.bf16 %v949_v48, %v949_v48  ;;  %v954_v53 = vpack.c.bf16 %v950_v49, %v950_v49  ;;  %v955_v60 = vpack.c.bf16 %v951_v58, %v951_v58  ;;  %v1447_v7 = vsel %vm1446_vm3, 1, %v2808_v5 }
 0x1c6   : > { %v956_v61 = vpack.c.bf16 %v952_v59, %v952_v59  ;;  %v1451_v8 = vrot.slane %v1447_v7, %v1450_v4 }
 0x1c8   : > { %vm1452_vm4 = vcmp.eq.s32.totalorder %v1451_v8, 1 }
 0x1ca   : > { %2381 = vmatmul.mubr.msk.bf16.vlgmr.msra.gmra.mxu1 %vm1257_vm2, %v953_v52  ;;  %2387 = vmatmul.mubr.msk.bf16.vlgmr.msra.gmra.mxu0 %vm1257_vm2, %v954_v53 }
 0x1cb   : > { %2391 = vmatpush3.bf16.xpose.msra.mxu1 %v1354_v56  ;;  %2397 = vmatpush3.bf16.xpose.msra.mxu0 %v1400_v57 }
 0x1cc   : > { %2392 = vmatprep.mubr.msk.bf16.mxu1 %vm2802_vm0, %v2801_v0  ;;  %2398 = vmatprep.mubr.msk.bf16.mxu0 %vm2802_vm0, %v2801_v0 }
 0x1cd   : > { %2402 = vmatprep.subr.bf16.mxu1 %v2801_v0  ;;  %2408 = vmatprep.subr.bf16.mxu0 %v2801_v0 }
 0x1d2   : > { %2393 = vmatmul.mubr.msk.bf16.vlgmr.msra.gmra.mxu1 %vm1257_vm2, %v955_v60  ;;  %2399 = vmatmul.mubr.msk.bf16.vlgmr.msra.gmra.mxu0 %vm1257_vm2, %v956_v61 }
 0x1d3   : > { %2404 = vmatprep.mubr.msk.bf16.mxu1 %vm2802_vm0, %v2801_v0  ;;  %2410 = vmatprep.mubr.msk.bf16.mxu0 %vm2802_vm0, %v2801_v0 }
 0x28a   : > { %v1298_v9 = vpop.f32.mrf.mxu1  ;;  %v1344_v10 = vpop.f32.mrf.mxu0 }
 0x28b   : > { %v1442_v11 = vmul.f32 0.35355338, %v1298_v9  ;;  %v1443_v12 = vmul.f32 0.35355338, %v1344_v10 }
 0x28c   : > { %v2382_v13 = vpop.f32.mrf.mxu1  ;;  %v2388_v14 = vpop.f32.mrf.mxu0 }
 0x28d   : > { %v1453_v15 = vsel %vm1452_vm4, -1e+30, %v1442_v11  ;;  %v1454_v16 = vsel %vm1452_vm4, -1e+30, %v1443_v12 }
 0x28e   : > { %v1301_v17 = vpop.f32.mrf.mxu1  ;;  %v1347_v18 = vpop.f32.mrf.mxu0  ;;  %v1457_v19 = vsel %vm1257_vm2, %v1453_v15, -inf  ;;  %v1460_v27 = vsel %vm1257_vm2, %v1454_v16, -inf }
 0x28f   : > { %1458 = vmax.xlane.f32.xlu0 %v1457_v19  ;;  %1461 = vmax.xlane.f32.xlu1 %v1460_v27 }
 0x290   : > { %v2383_v20 = vpop.f32.mrf.mxu1  ;;  %v2389_v21 = vpop.f32.mrf.mxu0 }
 0x292   : > { %v1390_v22 = vpop.f32.mrf.mxu1  ;;  %v1436_v23 = vpop.f32.mrf.mxu0 }
 0x293   : > { %v1444_v24 = vmul.f32 0.35355338, %v1390_v22  ;;  %v1445_v25 = vmul.f32 0.35355338, %v1436_v23 }
 0x294   : > { %v2394_v26 = vpop.f32.mrf.mxu1  ;;  %v2400_v28 = vpop.f32.mrf.mxu0 }
 0x295   : > { %v1455_v29 = vsel %vm1452_vm4, -1e+30, %v1444_v24  ;;  %v1456_v34 = vsel %vm1452_vm4, -1e+30, %v1445_v25 }
 0x296   : > { %v1393_v30 = vpop.f32.mrf.mxu1  ;;  %v1439_v32 = vpop.f32.mrf.mxu0  ;;  %v1463_v33 = vsel %vm1257_vm2, %v1455_v29, -inf  ;;  %v1466_v37 = vsel %vm1257_vm2, %v1456_v34, -inf }
 0x297   : > { %1464 = vmax.xlane.f32.xlu0 %v1463_v33 }
 0x298   : > { %v2395_v35 = vpop.f32.mrf.mxu1  ;;  %v2401_v36 = vpop.f32.mrf.mxu0 }
 0x29b   : > { %1467 = vmax.xlane.f32.xlu0 %v1466_v37 }
 0x2a0   : > { %1108 = vrot.lane.b32.xlu1 %v802_v40, %s2804_s28  ;;  %s603_s28 = scalar_lea.vmem [#allocation10], %s3029_s13 }
 0x2a1   : > { %s2125_s26 = sshll.u32 %s603_s28, 4  ;;  %s2126_s26 = int_to_ptr.vmem [resolvable:$true] %s2125_s26 }
 0x2a2   : > { %s2701_s30 = scalar_lea.vmem %s2126_s26, 64 }
 0x2a3   : > { %p2702_p3 = scmp.ne.s32.totalorder %s2126_s26, %s2701_s30 }
 0x2a5   : > { %p2703_p7 = pnand %p2702_p3, %p2984_p9 }
 0x2a7   : > { %p2704_p13 = pneg %p2703_p7 }
 0x318   : > { %v1459_v41 = vpop.xlane.xlu0 %1458  ;;  %v1462_v42 = vpop.xlane.xlu1 %1461 }
 0x319   : > { %v1469_v43 = vsub.f32 %v1453_v15, %v1459_v41  ;;  %v1470_v44 = vsub.f32 %v1454_v16, %v1462_v42 }
 0x31b   : > { %v1473_v45 = vmul.f32 1.442695, %v1469_v43  ;;  %v1475_v46 = vmul.f32 1.442695, %v1470_v44 }
 0x31c   : > { %v1109_v61 = vpop.permute.xlu1 %1108 }
 0x31d   : > { %2569 = vpow2.f32 %v1473_v45 }
 0x31e   : > { %2571 = vpow2.f32 %v1475_v46 }
 0x320   : > { %v1465_v51 = vpop.xlane.xlu0 %1464 }
 0x321   : > { %v1471_v53 = vsub.f32 %v1455_v29, %v1465_v51 }
 0x323   : > { %v1477_v55 = vmul.f32 1.442695, %v1471_v53 }
 0x324   : > { %v1468_v52 = vpop.xlane.xlu0 %1467 }
 0x325   : > { %v1472_v54 = vsub.f32 %v1456_v34, %v1468_v52  ;;  %2573 = vpow2.f32 %v1477_v55 }
 0x327   : > { %v1479_v56 = vmul.f32 1.442695, %v1472_v54 }
 0x329   : > { %2575 = vpow2.f32 %v1479_v56 }
 0x32a   : > { %v3183_v47 = vpop.eup %2569 }
 0x32b   : > { %v3185_v48 = vpop.eup %2571  ;;  %v1481_v49 = vsel %vm1257_vm2, %v3183_v47, 0.0 }
 0x32c   : > { %1482 = vadd.xlane.f32.xlu1 %v1481_v49  ;;  %v1484_v50 = vsel %vm1257_vm2, %v3185_v48, 0.0 }
 0x32d   : > { %1485 = vadd.xlane.f32.xlu0 %v1484_v50 }
 0x332   : > { %v3193_v57 = vpop.eup %2573 }
 0x333   : > { %v1487_v59 = vsel %vm1257_vm2, %v3193_v57, 0.0 }
 0x336   : > { %v3195_v58 = vpop.eup %2575 }
 0x337   : > { %v1490_v60 = vsel %vm1257_vm2, %v3195_v58, 0.0 }
 0x33d   : > { %1114 = vrot.lane.b32.xlu1 %v802_v40, %s2803_s22  ;;  %s3386_s22 = sld [smem:[#allocation23_spill]] }
 0x343   : > { %1111 = vrot.lane.b32.xlu0 %v802_v40, %s2805_s27 }
 0x361   : > { %1488 = vadd.xlane.f32.xlu1 %v1487_v59 }
 0x362   : > { %1491 = vadd.xlane.f32.xlu0 %v1490_v60 }
 0x3b5   : > { %v1483_v62 = vpop.xlane.xlu1 %1482 }
 0x3b6   : > { %v1486_v63 = vpop.xlane.xlu0 %1485  ;;  %2577 = vrcp.f32 %v1483_v62 }
 0x3b7   : > { %2579 = vrcp.f32 %v1486_v63 }
 0x3b9   : > { %v1115_v1 = vpop.permute.xlu1 %1114 }
 0x3ba   : > { %v1133_v2 = vcombine.low %v1109_v61, %v1115_v1  ;;  %v1134_v3 = vcombine.high %v1109_v61, %v1115_v1  ;;  %v1112_v4 = vpop.permute.xlu0 %1111 }
 0x3bb   : > { %v1117_v5 = vcombine.low %v802_v40, %v1112_v4  ;;  %v1118_v7 = vcombine.high %v802_v40, %v1112_v4 }
 0x3bc   : > { %v1141_v8 = vrot.slane %v1133_v2, %v3108_v31  ;;  %v1148_v9 = vrot.slane %v1134_v3, %v3108_v31 }
 0x3bd   : > { %v1125_v10 = vrot.slane %v1117_v5, %v3108_v31  ;;  %v1132_v11 = vrot.slane %v1118_v7, %v3108_v31 }
 0x3bf   : > { %v1149_v12 = vcombine.low %v1125_v10, %v1141_v8  ;;  %v1150_v13 = vcombine.high %v1125_v10, %v1141_v8  ;;  %v1165_v14 = vcombine.low %v1132_v11, %v1148_v9  ;;  %v1166_v15 = vcombine.high %v1132_v11, %v1148_v9 }
 0x3c1   : > { %v1157_v16 = vrot.slane %v1149_v12, %v3111_v38  ;;  %v1164_v17 = vrot.slane %v1150_v13, %v3111_v38  ;;  %v1173_v18 = vrot.slane %v1165_v14, %v3111_v38  ;;  %v1180_v19 = vrot.slane %v1166_v15, %v3111_v38 }
 0x3c3   : > { %v1185_v27 = vcombine.low %v1157_v16, %v1164_v17  ;;  %v2288_v20 = vcombine.high %v1157_v16, %v1164_v17  ;;  %v1201_v21 = vcombine.low %v1173_v18, %v1180_v19  ;;  %v2289_v22 = vcombine.high %v1173_v18, %v1180_v19  ;;  %v2578_v33 = vpop.eup %2577 }
 0x3c4   : > { %v2580_v39 = vpop.eup %2579  ;;  %v1497_v46 = vmul.f32 %v2578_v33, %v3183_v47 }
 0x3c5   : > { %v1192_v23 = vrot.slane %v1185_v27, %v3108_v31  ;;  %v1200_v24 = vrot.slane %v2288_v20, %v3108_v31  ;;  %v1208_v25 = vrot.slane %v1201_v21, %v3108_v31  ;;  %v1216_v26 = vrot.slane %v2289_v22, %v3108_v31 }
 0x3c6   : > { %v1498_v49 = vmul.f32 %v2580_v39, %v3185_v48  ;;  %v1501_v54 = vpack.c.bf16 %v1497_v46, %v1497_v46 }
 0x3c7   : > { %v1217_v28 = vcombine.low %v1192_v23, %v1200_v24  ;;  %v1233_v29 = vcombine.low %v1208_v25, %v1216_v26  ;;  %v1218_v30 = vcombine.high %v1192_v23, %v1200_v24  ;;  %v1234_v32 = vcombine.high %v1208_v25, %v1216_v26 }
 0x3c8   : > { %v1502_v55 = vpack.c.bf16 %v1498_v49, %v1498_v49 }
 0x3c9   : > { %v1225_v34 = vrot.slane %v1217_v28, %v3111_v38  ;;  %v1241_v35 = vrot.slane %v1233_v29, %v3111_v38  ;;  %v1232_v36 = vrot.slane %v1218_v30, %v3111_v38  ;;  %v1248_v37 = vrot.slane %v1234_v32, %v3111_v38  ;;  %v2561_v29 = vld [vmem:[#allocation7 + $0x8] sm:$0xff]  }
 0x3cb   : > { %v1249_v40 = vcombine.low %v1225_v34, %v1241_v35  ;;  %v1250_v41 = vcombine.high %v1225_v34, %v1241_v35  ;;  %v1251_v42 = vcombine.low %v1232_v36, %v1248_v37  ;;  %v1252_v43 = vcombine.high %v1232_v36, %v1248_v37 }
 0x3cd   : > { %v1253_v44 = vpack.c.bf16 %v1249_v40, %v1249_v40  ;;  %v1254_v45 = vpack.c.bf16 %v1250_v41, %v1250_v41  ;;  %v1255_v52 = vpack.c.bf16 %v1251_v42, %v1251_v42  ;;  %v1256_v53 = vpack.c.bf16 %v1252_v43, %v1252_v43  ;;  %v2562_v41 = vld [vmem:[#allocation7] sm:$0xff]  }
 0x3cf   : > { %v1510_v50 = vsel %vm1508_vm5, %v1253_v44, 0  ;;  %v1556_v51 = vsel %vm1508_vm5, %v1254_v45, 0  ;;  %v1602_v47 = vsel %vm1508_vm5, %v1255_v52, 0  ;;  %v1648_v48 = vsel %vm1508_vm5, %v1256_v53, 0 }
 0x3d0   : > { %2403 = vmatpush3.bf16.msra.mxu1 %v1510_v50  ;;  %2409 = vmatpush3.bf16.msra.mxu0 %v1556_v51 }
 0x3d1   : > { %2414 = vmatprep.subr.bf16.mxu1 %v2801_v0  ;;  %2420 = vmatprep.subr.bf16.mxu0 %v2801_v0 }
 0x3d3   : > { %2405 = vmatmul.mubr.msk.bf16.vlgmr.msra.gmra.mxu1 %vm1257_vm2, %v1501_v54  ;;  %2411 = vmatmul.mubr.msk.bf16.vlgmr.msra.gmra.mxu0 %vm1257_vm2, %v1502_v55 }
 0x3d4   : > { %2415 = vmatpush3.bf16.msra.mxu1 %v1602_v47  ;;  %2421 = vmatpush3.bf16.msra.mxu0 %v1648_v48 }
 0x3d5   : > { %2416 = vmatprep.mubr.msk.bf16.mxu1 %vm2802_vm0, %v2801_v0  ;;  %2422 = vmatprep.mubr.msk.bf16.mxu0 %vm2802_vm0, %v2801_v0 }
 0x3d6   : > { %2426 = vmatprep.subr.bf16.mxu1 %v2801_v0  ;;  %2434 = vmatprep.subr.bf16.mxu0 %v2801_v0 }
 0x3ea   : > { %v1489_v56 = vpop.xlane.xlu1 %1488 }
 0x3eb   : > { %2581 = vrcp.f32 %v1489_v56  ;;  %v1492_v59 = vpop.xlane.xlu0 %1491 }
 0x3ec   : > { %2583 = vrcp.f32 %v1492_v59 }
 0x3f8   : > { %v2582_v60 = vpop.eup %2581 }
 0x3f9   : > { %v2584_v61 = vpop.eup %2583  ;;  %v1499_v62 = vmul.f32 %v2582_v60, %v3193_v57 }
 0x3fa   : > { %v1500_v63 = vmul.f32 %v2584_v61, %v3195_v58 }
 0x3fb   : > { %v1503_v1 = vpack.c.bf16 %v1499_v62, %v1499_v62 }
 0x3fc   : > { %v1504_v2 = vpack.c.bf16 %v1500_v63, %v1500_v63 }
 0x3fd   : > { %2417 = vmatmul.mubr.msk.bf16.vlgmr.msra.gmra.mxu1 %vm1257_vm2, %v1503_v1 }
 0x3fe   : > { %2423 = vmatmul.mubr.msk.bf16.vlgmr.msra.gmra.mxu0 %vm1257_vm2, %v1504_v2  ;;  %2430 = vmatprep.mubr.msk.bf16.mxu1 %vm2802_vm0, %v2801_v0  ;;  %v2300_v2 = vld [vmem:[%s3386_s22] ss:$0 sm:$0xff]  ;;  %s2315_s22 = sshll.u32 %s2785_s21, 6 }
 0x3ff   : > { %2438 = vmatprep.mubr.msk.bf16.mxu0 %vm2802_vm0, %v2801_v0  ;;  %2427 = vmatpush3.bf16.msra.mxu1 %v2561_v29  ;;  %v2567_v29 = vld [vmem:[%s3387_s15 + $0x8] sm:$0xff]   ;;  %s2123_s16 = scalar_lea.hbm %s3390_s24, %s2315_s22 }
 0x400   : > { %2428 = vmatprep.subr.bf16.mxu1 %v2801_v0 }
 0x403   : > { %2429 = vmatpush3.bf16.msra.mxu1 %v2562_v41 }
 0x404   : > { %2442 = vmatprep.subr.bf16.mxu1 %v2801_v0 }
 0x493   : > { %v1546_v3 = vpop.f32.mrf.mxu1  ;;  %v1592_v4 = vpop.f32.mrf.mxu0 }
 0x495   : > { %v2406_v5 = vpop.f32.mrf.mxu1  ;;  %v2412_v7 = vpop.f32.mrf.mxu0 }
 0x497   : > { %v1549_v8 = vpop.f32.mrf.mxu1  ;;  %v1595_v57 = vpop.f32.mrf.mxu0 }
 0x499   : > { %v2407_v9 = vpop.f32.mrf.mxu1  ;;  %v2413_v58 = vpop.f32.mrf.mxu0 }
 0x4bd   : > { %v1638_v10 = vpop.f32.mrf.mxu1 }
 0x4be   : > { %v1690_v11 = vcombine.low %v1546_v3, %v1638_v10  ;;  %v1691_v12 = vcombine.high %v1546_v3, %v1638_v10  ;;  %v1684_v13 = vpop.f32.mrf.mxu0  ;;  %v1910_v3 = vunpack.c.l.bf16 %v3071_v6  ;;  %v2565_v6 = vld [vmem:[%s3387_s15 + $0x18] sm:$0xff]  }
 0x4bf   : > { %v1706_v14 = vcombine.low %v1592_v4, %v1684_v13  ;;  %v1707_v15 = vcombine.high %v1592_v4, %v1684_v13  ;;  %v2418_v16 = vpop.f32.mrf.mxu1 }
 0x4c0   : > { %v1698_v17 = vrot.slane %v1690_v11, %v3108_v31  ;;  %v1705_v18 = vrot.slane %v1691_v12, %v3108_v31  ;;  %v2424_v19 = vpop.f32.mrf.mxu0  ;;  %v2564_v16 = vld [vmem:[#allocation8] sm:$0xff]  }
 0x4c1   : > { %v1714_v27 = vrot.slane %v1706_v14, %v3108_v31  ;;  %v1721_v20 = vrot.slane %v1707_v15, %v3108_v31  ;;  %v1641_v21 = vpop.f32.mrf.mxu1  ;;  %v2563_v15 = vld [vmem:[#allocation8 + $0x8] sm:$0xff]  }
 0x4c2   : > { %v1687_v22 = vpop.f32.mrf.mxu0  ;;  %2435 = vmatpush3.bf16.msra.mxu0 %v2563_v15 }
 0x4c3   : > { %v1722_v23 = vcombine.low %v1698_v17, %v1714_v27  ;;  %v1723_v24 = vcombine.high %v1698_v17, %v1714_v27  ;;  %v1738_v25 = vcombine.low %v1705_v18, %v1721_v20  ;;  %v1739_v26 = vcombine.high %v1705_v18, %v1721_v20  ;;  %v2419_v28 = vpop.f32.mrf.mxu1  ;;  %2436 = vmatprep.subr.bf16.mxu0 %v2801_v0  ;;  %v2566_v17 = vld [vmem:[%s3387_s15 + $0x10] sm:$0xff]  }
 0x4c4   : > { %v2425_v30 = vpop.f32.mrf.mxu0 }
 0x4c5   : > { %v1730_v32 = vrot.slane %v1722_v23, %v3111_v38  ;;  %v1737_v33 = vrot.slane %v1723_v24, %v3111_v38  ;;  %v1746_v34 = vrot.slane %v1738_v25, %v3111_v38  ;;  %v1753_v35 = vrot.slane %v1739_v26, %v3111_v38  ;;  %v2568_v30 = vld [vmem:[%s3387_s15] sm:$0xff]  }
 0x4c6   : > { %2437 = vmatpush3.bf16.msra.mxu0 %v2564_v16 }
 0x4c7   : > { %v1758_v36 = vcombine.low %v1730_v32, %v1737_v33  ;;  %v2298_v37 = vcombine.high %v1730_v32, %v1737_v33  ;;  %v1774_v39 = vcombine.low %v1746_v34, %v1753_v35  ;;  %v2299_v40 = vcombine.high %v1746_v34, %v1753_v35 }
 0x4c9   : > { %v1765_v42 = vrot.slane %v1758_v36, %v3108_v31  ;;  %v1773_v43 = vrot.slane %v2298_v37, %v3108_v31  ;;  %v1781_v44 = vrot.slane %v1774_v39, %v3108_v31  ;;  %v1789_v45 = vrot.slane %v2299_v40, %v3108_v31 }
 0x4cb   : > { %v1791_v46 = vcombine.high %v1765_v42, %v1773_v43  ;;  %v1807_v49 = vcombine.high %v1781_v44, %v1789_v45  ;;  %v1790_v50 = vcombine.low %v1765_v42, %v1773_v43  ;;  %v1806_v51 = vcombine.low %v1781_v44, %v1789_v45 }
 0x4cd   : > { %v1805_v52 = vrot.slane %v1791_v46, %v3111_v38  ;;  %v1821_v53 = vrot.slane %v1807_v49, %v3111_v38  ;;  %v1798_v54 = vrot.slane %v1790_v50, %v3111_v38  ;;  %v1814_v55 = vrot.slane %v1806_v51, %v3111_v38 }
 0x4cf   : > { %v1824_v47 = vcombine.low %v1805_v52, %v1821_v53  ;;  %v1823_v48 = vcombine.high %v1798_v54, %v1814_v55  ;;  %v1822_v56 = vcombine.low %v1798_v54, %v1814_v55  ;;  %v1825_v31 = vcombine.high %v1805_v52, %v1821_v53 }
 0x4d1   : > { %1831 = vrot.lane.b32.xlu1 %v1824_v47, %s2809_s17  ;;  %1827 = vrot.lane.b32.xlu0 %v1823_v48, %s2810_s11  ;;  %s3388_s11 = sld [smem:[#allocation25_spill]]  ;;  %s2705_s17 = sshll.u32 %s2812_s0, 4  ;;  %s2706_s17 = int_to_ptr.vmem [resolvable:$false] %s2705_s17 }
 0x4d2   : > { %s2707_s21 = scalar_lea.vmem %s2706_s17, 128  ;;  %p2708_p5 = scmp.lt.s32.totalorder %s2126_s26, %s2706_s17 }
 0x4d3   : > { %p2709_p10 = scmp.lt.s32.totalorder %s2707_s21, %s2701_s30 }
 0x4d5   : > { %1835 = vrot.lane.b32.xlu1 %v1825_v31, %s2811_s1  ;;  %p2710_p1 = por %p2709_p10, %p2708_p5 }
 0x4d7   : > { %v2304_v32 = vld [vmem:[%s3388_s11] ss:$0 sm:$0xff]  ;;  %p2711_p2 = pnand %p2710_p1, %p2704_p13 }
 0x543   : > { %v1832_v59 = vpop.permute.xlu1 %1831  ;;  %v1828_v60 = vpop.permute.xlu0 %1827 }
 0x544   : > { %v1838_v61 = vsel %vm1257_vm2, %v1822_v56, %v1828_v60 }
 0x545   : > { %v1840_v63 = vsel %vm1839_vm6, %v1838_v61, %v1832_v59 }
 0x547   : > { %v1836_v62 = vpop.permute.xlu1 %1835 }
 0x548   : > { %v1842_v1 = vsel %vm1841_vm7, %v1840_v63, %v1836_v62 }
 0x549   : > { %v1843_v38 = vpack.c.bf16 %v1842_v1, %v1842_v1 }
 0x54b   : > { %2431 = vmatmul.mubr.msk.bf16.vlgmr.msra.gmra.mxu1 %vm634_vm1, %v1843_v38 }
 0x54c   : > { %2450 = vmatprep.mubr.msk.bf16.mxu1 %vm2802_vm0, %v2801_v0  ;;  %2443 = vmatpush3.bf16.msra.mxu1 %v2565_v6 }
 0x54d   : > { %2444 = vmatprep.subr.bf16.mxu1 %v2801_v0 }
 0x550   : > { %2445 = vmatpush3.bf16.msra.mxu1 %v2566_v17 }
 0x551   : > { %2446 = vmatprep.subr.bf16.mxu1 %v2801_v0 }
 0x554   : > { %2447 = vmatpush3.bf16.msra.mxu1 %v2567_v29 }
 0x555   : > { %2448 = vmatprep.subr.bf16.mxu1 %v2801_v0  ;;  %v2308_v0 = vld [vmem:[%s3389_s10] ss:$0 sm:$0xff] }
 0x558   : > { %2449 = vmatpush3.bf16.msra.mxu1 %v2568_v30 }
 0x60b   : > { %v1904_v4 = vpop.f32.mrf.mxu1 }
 0x60c   : > { %v1905_v5 = vadd.f32 %v2300_v2, %v1904_v4 }
 0x60d   : > { %v2432_v7 = vpop.f32.mrf.mxu1 }
 0x60e   : > { %v1911_v8 = vadd.f32 %v1910_v3, %v1905_v5 }
 0x60f   : > { %v1907_v57 = vpop.f32.mrf.mxu1 }
 0x610   : > { %v1912_v9 = vsel %vm634_vm1, %v1911_v8, 0.0 }
 0x611   : > { %1913 = vadd.xlane.f32.xlu0 %v1912_v9  ;;  %v2433_v58 = vpop.f32.mrf.mxu1 }
 0x69a   : > { %v1914_v10 = vpop.xlane.xlu0 %1913 }
 0x69b   : > { %v1916_v11 = vmul.f32 0.03125, %v1914_v10 }
 0x69d   : > { %v1917_v12 = vsub.f32 %v1911_v8, %v1916_v11 }
 0x69f   : > { %v1918_v13 = vmul.f32 %v1917_v12, %v1917_v12 }
 0x6a1   : > { %v1919_v14 = vsel %vm634_vm1, %v1918_v13, 0.0 }
 0x6a2   : > { %1920 = vadd.xlane.f32.xlu1 %v1919_v14 }
 0x72b   : > { %v1921_v18 = vpop.xlane.xlu1 %1920 }
 0x72c   : > { %v1923_v19 = vmul.f32 0.032258064, %v1921_v18 }
 0x72e   : > { %2585 = vrsqrt.f32 %v1923_v19  ;;  %vm1926_vm8 = vcmp.eq.f32.partialorder %v1923_v19, inf  ;;  %v1929_v21 = vand.u32 2147483648, %v1923_v19  ;;  %vm1928_vm9 = vcmp.eq.f32.partialorder %v1923_v19, 0.0 }
 0x73b   : > { %v2586_v27 = vpop.eup %2585 }
 0x73c   : > { %v1925_v20 = vmul.f32 %v2586_v27, %v1923_v19 }
 0x73e   : > { %v1927_v22 = vsel %vm1926_vm8, %v1923_v19, %v1925_v20 }
 0x73f   : > { %v1930_v23 = vsel %vm1928_vm9, %v1929_v21, %v1927_v22 }
 0x740   : > { %v1931_v24 = vadd.f32 1e-06, %v1930_v23 }
 0x742   : > { %2587 = vrsqrt.f32 %v1931_v24 }
 0x74f   : > { %v2588_v25 = vpop.eup %2587 }
 0x750   : > { %v1933_v26 = vmul.f32 %v2588_v25, %v1917_v12 }
 0x752   : > { %v1934_v28 = vpack.c.bf16 %v1933_v26, %v1933_v26 }
 0x754   : > { %2439 = vmatmul.mubr.msk.bf16.vlgmr.msra.gmra.mxu0 %vm634_vm1, %v1934_v28 }
 0x814   : > { %v1995_v33 = vpop.f32.mrf.mxu0 }
 0x815   : > { %v1996_v34 = vadd.f32 %v2304_v32, %v1995_v33 }
 0x816   : > { %v2440_v35 = vpop.f32.mrf.mxu0 }
 0x817   : > { %v2001_v36 = vmax.f32 %v1996_v34, 0.0 }
 0x818   : > { %v1998_v37 = vpop.f32.mrf.mxu0 }
 0x819   : > { %v2002_v39 = vpack.c.bf16 %v2001_v36, %v2001_v36 }
 0x81a   : > { %v2441_v40 = vpop.f32.mrf.mxu0 }
 0x81b   : > { %2451 = vmatmul.mubr.msk.bf16.vlgmr.msra.gmra.mxu1 %vm2042_vm10, %v2002_v39 }
 0x8db   : > { %v2080_v41 = vpop.f32.mrf.mxu1 }
 0x8dc   : > { %v2081_v42 = vadd.f32 %v2308_v0, %v2080_v41 }
 0x8dd   : > { %v2452_v43 = vpop.f32.mrf.mxu1 }
 0x8de   : > { %v2086_v44 = vadd.f32 %v2081_v42, %v1933_v26 }
 0x8df   : > { %v2083_v45 = vpop.f32.mrf.mxu1 }
 0x8e0   : > { %v2087_v46 = vsel %vm634_vm1, %v2086_v44, 0.0 }
 0x8e1   : > { %2088 = vadd.xlane.f32.xlu0 %v2087_v46  ;;  %v2453_v49 = vpop.f32.mrf.mxu1 }
 0x96a   : > { %v2089_v50 = vpop.xlane.xlu0 %2088 }
 0x96b   : > { %v2090_v51 = vmul.f32 0.03125, %v2089_v50 }
 0x96d   : > { %v2091_v52 = vsub.f32 %v2086_v44, %v2090_v51 }
 0x96f   : > { %v2092_v53 = vmul.f32 %v2091_v52, %v2091_v52 }
 0x971   : > { %v2093_v54 = vsel %vm634_vm1, %v2092_v53, 0.0 }
 0x972   : > { %2094 = vadd.xlane.f32.xlu0 %v2093_v54 }
 0x9fb   : > { %v2095_v55 = vpop.xlane.xlu0 %2094 }
 0x9fc   : > { %v2096_v47 = vmul.f32 0.032258064, %v2095_v55 }
 0x9fe   : > { %2589 = vrsqrt.f32 %v2096_v47  ;;  %vm2099_vm11 = vcmp.eq.f32.partialorder %v2096_v47, inf  ;;  %v2102_v31 = vand.u32 2147483648, %v2096_v47  ;;  %vm2101_vm12 = vcmp.eq.f32.partialorder %v2096_v47, 0.0 }
 0xa0b   : > { %v2590_v48 = vpop.eup %2589 }
 0xa0c   : > { %v2098_v56 = vmul.f32 %v2590_v48, %v2096_v47 }
 0xa0e   : > { %v2100_v59 = vsel %vm2099_vm11, %v2096_v47, %v2098_v56 }
 0xa0f   : > { %v2103_v60 = vsel %vm2101_vm12, %v2102_v31, %v2100_v59 }
 0xa10   : > { %v2104_v61 = vadd.f32 1e-06, %v2103_v60 }
 0xa12   : > { %2591 = vrsqrt.f32 %v2104_v61 }
 0xa1f   : > { %v2592_v62 = vpop.eup %2591 }
 0xa20   : > { %v2106_v63 = vmul.f32 %v2592_v62, %v2091_v52 }
 0xa22   : > { %v2107_v1 = vpack.c.bf16 %v2106_v63, %v2106_v63 }
 0xa24   : > { %2109 = vst.msk [vmem:[%s603_s28] sm:$0xf] %vm2108_vm13, %v2107_v1 }
 0xa25   : > { %2714 = shalt.err (!%p2711_p2)
}
 0xa26   : > { %s2715_s13 = scalar_lea.hbm %s2123_s16, 64  ;;  %s2719_s1 = scalar_lea.hbm %s3390_s24, 128 }
 0xa27   : > { %p2716_p6 = scmp.ne.s32.totalorder %s2123_s16, %s2715_s13  ;;  %p2720_p0 = scmp.lt.s32.totalorder %s2123_s16, %s3390_s24 }
 0xa28   : > { %p2721_p12 = scmp.lt.s32.totalorder %s2719_s1, %s2715_s13 }
 0xa29   : > { %p2717_p8 = pnand %p2716_p6, %p2984_p9 }
 0xa2a   : > { %p2722_p4 = por %p2721_p12, %p2720_p0 }
 0xa2b   : > { %p2718_p11 = pneg %p2717_p8 }
 0xa2d   : > { %p2723_p3 = pnand %p2722_p4, %p2718_p11 }
 0xa2f   : > { %2726 = shalt.err (!%p2723_p3)
}
 0xa30   : > { %2466 = dma.vmem_to_hbm [thread:$0]  (%p2984_p9), %s2126_s26, 64, %s2123_s16, %s2111_s25  }
 0xa31 PF: > { %s3391_s22 = sld [smem:[#allocation16_spill]]  ;;  %p3394_p13 = scmp.ge.s32.totalorder %s2793_s23, 2 }
 0xa32   : > { %s3392_s28 = sld [smem:[#allocation18_spill]] }
 0xa37   : > { %s2137_s27 = sand.u32 1, %s3391_s22  }
 0xa38   : > { %p3393_p7 = scmp.ne.s32.totalorder %s3392_s28, 0  ;;  %s2138_s14 = scalar_lea.sflag [#allocation4], %s2137_s27 }
 0xa3a   : > { %p2483_p5 = pnand %p3394_p13, %p3393_p7 }
 0xa3c   : > { %p2484_p10 = pneg %p2483_p5 }
 0xa3e   : > { %2768 = dma.done.wait (%p2484_p10), %s2138_s14, 64  }
 0xa3f   : > { %2770 = vsyncadd (%p2484_p10), %s2138_s14, 4294967232  ;;  %s35_s23 = sadd.s32 1, %s2793_s23   ;;  %s3395_s21 = sld [smem:[#allocation17_spill]] }
 0xa40   : > { %p32_p1 = scmp.ge.s32.totalorder %s35_s23, 4   ;;  %s3396_s22 = sld [smem:[#allocation19_spill]] }
 0xa41   : > { %s3397_s18 = smov %s2777_s19  ;;  %s3398_s19 = smov %s2781_s20 }
 0xa42   : > { %s3399_s20 = smov %s2993_s29  ;;  %34 = sbr.rel (!%p32_p1) target bundleno = 19 (0x13), region = 149 }
 0xa47   :  { %2143 = vsyncpa [#allocation3], 1 }
 0xa48   :  { %2145 = vsyncpa [#allocation3 + $0x1], 1 }
 0xa49   :  { %2146 = vsyncpa [#allocation6], 1 }
 0xa4a   :  { %2148 = vsyncpa [#allocation6 + $0x1], 1 }
 0xa4b   :  { %2149 = vsyncpa [#allocation9], 1 }
 0xa4c   :  { %2150 = vsyncpa [#allocation4], 1 }
 0xa4d   :  { %2152 = vsyncpa [#allocation4 + $0x1], 1 }

</bundles_post_ra>
